<compile_context>
chip_gen: v7x
topology: tpu7x:2x2x1
jax: 0.10.0
libtpu: 0.0.40
codegen_flags: <defaults>
</compile_context>

<pallas_src>
import jax
import jax.numpy as jnp
from jax.experimental import pallas as pl
from jax.experimental.pallas import tpu as pltpu

_LANE = 128


# ----------------------------------------------------------------------------
# Pallas kernel: separable bilinear grid_sample + mean over cameras + clamp
# ----------------------------------------------------------------------------
def _project_kernel(hm_ref, wx_ref, wy_ref, out_ref, acc_ref):
    # hm_ref:  (1, B*J*H, W)  one camera's heatmap slab (streamed per camera)
    # wx_ref:  (1, W, TB)     x-axis bilinear weights for this bin tile (1/N folded in)
    # wy_ref:  (1, H, TB)     y-axis bilinear weights for this bin tile
    # out_ref: (B*J, TB)      lane-dense output tile (resident across the camera axis)
    # acc_ref: (B*J, TB) f32  accumulator scratch
    c = pl.program_id(1)

    @pl.when(c == 0)
    def _():
        acc_ref[...] = jnp.zeros_like(acc_ref)

    hm = hm_ref[0]                                    # (B*J*H, W)
    wx = wx_ref[0]                                    # (W, TB)
    wy = wy_ref[0]                                    # (H, TB)
    H, TB = wy.shape
    BJ = acc_ref.shape[0]

    # Stage 1 (MXU): contract the heatmap W axis against the x-weights.
    tmp = jnp.dot(hm, wx, preferred_element_type=jnp.float32)        # (B*J*H, TB)
    # Stage 2 (VPU multiply + XLU sublane reduce): weight by wy, reduce over H.
    # (reshape only splits the leading/sublane dim; H is a multiple of 8 for
    # typical heatmap sizes so this is layout-free.)
    acc_ref[...] += jnp.sum(tmp.reshape(BJ, H, TB) * wy[None, :, :], axis=1)

    @pl.when(c == pl.num_programs(1) - 1)
    def _():
        out_ref[...] = jnp.clip(acc_ref[...], 0.0, 1.0)


# ----------------------------------------------------------------------------
# Host-side precompute: separable bilinear sampling weights (plain JAX, once)
# ----------------------------------------------------------------------------
def _bilinear_weights(sample_grids, H, W):
    """sample_grids: (N, nbins, 2) normalized coords in [-1.1, 1.1].

    Returns wx: (N, W, nbins), wy: (N, H, nbins), f32, bins on the lane axis.
    Matches F.grid_sample(align_corners=True, padding_mode='zeros'): corners
    outside the image never match a valid row/col -> zero weight.
    """
    sample_grids = sample_grids.astype(jnp.float32)
    gx = sample_grids[..., 0]                                  # (N, nbins)
    gy = sample_grids[..., 1]
    x = (gx + 1.0) * 0.5 * jnp.float32(W - 1)
    y = (gy + 1.0) * 0.5 * jnp.float32(H - 1)
    x0f = jnp.floor(x)
    y0f = jnp.floor(y)
    x0 = x0f.astype(jnp.int32)
    y0 = y0f.astype(jnp.int32)
    wx1 = x - x0f
    wx0 = 1.0 - wx1
    wy1 = y - y0f
    wy0 = 1.0 - wy1

    cols = jnp.arange(W, dtype=jnp.int32)[None, :, None]       # (1, W, 1)
    rows = jnp.arange(H, dtype=jnp.int32)[None, :, None]       # (1, H, 1)
    x0e = x0[:, None, :]                                       # (N, 1, nbins)
    y0e = y0[:, None, :]
    wx_mat = ((cols == x0e).astype(jnp.float32) * wx0[:, None, :]
              + (cols == x0e + 1).astype(jnp.float32) * wx1[:, None, :])   # (N, W, nbins)
    wy_mat = ((rows == y0e).astype(jnp.float32) * wy0[:, None, :]
              + (rows == y0e + 1).astype(jnp.float32) * wy1[:, None, :])   # (N, H, nbins)
    return wx_mat, wy_mat


# ----------------------------------------------------------------------------
# Tiling / VMEM policy
# ----------------------------------------------------------------------------
def _round_up(x, m):
    return ((x + m - 1) // m) * m


def _tensorcores_per_chip():
    try:
        kind = jax.devices()[0].device_kind.lower()
    except Exception:
        return 1
    for tag in ("v7", "v5p", "v4"):        # 2-TensorCore ("megacore") chips
        if tag in kind:
            return 2
    return 1                               # v5e / v6e: single TensorCore


def _choose_bins_tiling(nbins, tile_bins=None):
    """Pick (tile_bins, num_tiles, nbins_pad); bin tiles are lane-dense (x128).

    Policy (perf review): even #tiles >= 2 on 2-TC chips so the 'parallel' bins
    axis feeds both TensorCores; one large tile on single-TC chips where extra
    grid steps only add per-step overhead and duplicate wx/wy DMA.
    """
    two_cores = _tensorcores_per_chip() == 2
    if tile_bins is None:
        if two_cores and nbins > _LANE:
            tile_bins = min(2048, max(_LANE, _round_up(nbins, 2 * _LANE) // 2))
        else:
            tile_bins = min(4096, _round_up(nbins, _LANE))
    tile_bins = max(_LANE, _round_up(tile_bins, _LANE))
    num_tiles = -(-nbins // tile_bins)
    if two_cores and num_tiles > 1 and num_tiles % 2 == 1:
        num_tiles += 1
    nbins_pad = num_tiles * tile_bins
    return tile_bins, num_tiles, nbins_pad


def _vmem_budget_bytes(bjh, bj, h, w, tile_bins, hm_itemsize):
    per_hm = bjh * w * hm_itemsize * 2          # double-buffered camera slab slice
    per_wx = w * tile_bins * hm_itemsize * 2
    per_wy = h * tile_bins * 4 * 2
    per_out = bj * tile_bins * 4 * 2
    acc = bj * tile_bins * 4
    tmp = bjh * tile_bins * 4                   # stage-1 matmul result
    need = per_hm + per_wx + per_wy + per_out + acc + tmp
    return int(min(64 << 20, 2 * need + (16 << 20)))


# ----------------------------------------------------------------------------
# Wrapper
# ----------------------------------------------------------------------------
def project_layer_forward(heatmaps, sample_grids, voxels_per_axis,
                          tile_bins=None, use_bf16=False):
    """heatmaps: (B, N, J, H, W) f32; sample_grids: (N, nbins, 2) f32."""
    B, N, J, H, W = heatmaps.shape
    nbins = sample_grids.shape[1]
    BJ, BJH = B * J, B * J * H

    tile_bins, num_tiles, nbins_pad = _choose_bins_tiling(nbins, tile_bins)
    compute_dtype = jnp.bfloat16 if use_bf16 else jnp.float32

    # Camera-major heatmap slab with (batch*joints*H) folded into the MXU M dim.
    hm = jnp.transpose(heatmaps, (1, 0, 2, 3, 4)).reshape(N, BJH, W).astype(compute_dtype)

    wx_mat, wy_mat = _bilinear_weights(sample_grids, H, W)      # (N,W,nbins),(N,H,nbins)
    wx_mat = wx_mat * jnp.float32(1.0 / N)                      # fold mean over cameras
    if nbins_pad != nbins:
        pad = nbins_pad - nbins                                 # padded bins get 0 weight
        wx_mat = jnp.pad(wx_mat, ((0, 0), (0, 0), (0, pad)))
        wy_mat = jnp.pad(wy_mat, ((0, 0), (0, 0), (0, pad)))
    wx_mat = wx_mat.astype(compute_dtype)                       # MXU operand
    wy_mat = wy_mat.astype(jnp.float32)                         # stage 2 stays f32

    out = pl.pallas_call(
        _project_kernel,
        out_shape=jax.ShapeDtypeStruct((BJ, nbins_pad), jnp.float32),
        grid_spec=pltpu.PrefetchScalarGridSpec(
            num_scalar_prefetch=0,
            grid=(num_tiles, N),                                # (bins tile, camera)
            in_specs=[
                pl.BlockSpec((1, BJH, W), lambda t, c: (c, 0, 0)),
                pl.BlockSpec((1, W, tile_bins), lambda t, c: (c, 0, t)),
                pl.BlockSpec((1, H, tile_bins), lambda t, c: (c, 0, t)),
            ],
            out_specs=pl.BlockSpec((BJ, tile_bins), lambda t, c: (0, t)),
            scratch_shapes=[pltpu.VMEM((BJ, tile_bins), jnp.float32)],
        ),
        compiler_params=pltpu.CompilerParams(
            dimension_semantics=("parallel", "arbitrary"),
            vmem_limit_bytes=_vmem_budget_bytes(
                BJH, BJ, H, W, tile_bins, jnp.dtype(compute_dtype).itemsize)),
    )(hm, wx_mat, wy_mat)

    vx, vy, vz = voxels_per_axis
    return out[:, :nbins].reshape(B, J, vx, vy, vz)


# ----------------------------------------------------------------------------
# Plain-JAX glue: voxel grid construction and per-camera cached sample grid
# (equivalent of the PyTorch module's self.grid / self.sample_grid[seq]; the
# per-sequence caching and meta/cameras dict handling are host-side Python.)
# ----------------------------------------------------------------------------
def compute_grid(space_size, space_center, voxels_per_axis):
    gx = jnp.linspace(-space_size[0] / 2, space_size[0] / 2, voxels_per_axis[0]) + space_center[0]
    gy = jnp.linspace(-space_size[1] / 2, space_size[1] / 2, voxels_per_axis[1]) + space_center[1]
    gz = jnp.linspace(-space_size[2] / 2, space_size[2] / 2, voxels_per_axis[2]) + space_center[2]
    X, Y, Z = jnp.meshgrid(gx, gy, gz, indexing="ij")
    return jnp.stack([X.ravel(), Y.ravel(), Z.ravel()], axis=1)       # (nbins, 3)


# TODO(synk): project_pose / do_transform come from external utils in the repo;
# a standard pinhole projection + 2x3 affine resize transform is used here.
def project_pose(points, cam):
    xcam = (points - cam["T"][None, :]) @ cam["R"].T                   # (nbins, 3)
    z = jnp.maximum(xcam[:, 2:3], 1e-6)
    return xcam[:, :2] / z * cam["f"][None, :] + cam["c"][None, :]     # (nbins, 2)


def do_transform(xy, trans):                                           # trans: (2, 3)
    return xy @ trans[:, :2].T + trans[:, 2][None, :]


def project_grid(grid3d, cam, image_size, heatmap_size, ori_wh, resize_transform):
    w, h = heatmap_size
    xy = project_pose(grid3d, cam)
    xy = jnp.clip(xy, -1.0, float(max(ori_wh)))
    xy = do_transform(xy, resize_transform)
    xy = xy * jnp.array([w, h], jnp.float32) / jnp.array(image_size, jnp.float32)
    sample_grid = xy / jnp.array([w - 1, h - 1], jnp.float32) * 2.0 - 1.0
    return jnp.clip(sample_grid, -1.1, 1.1)                            # (nbins, 2)


def make_camera(angle, target, f, c):
    dist = 5000.0
    pos = jnp.array([target[0] + dist * jnp.cos(angle),
                     target[1] + dist * jnp.sin(angle),
                     target[2] + 1500.0], jnp.float32)
    zaxis = jnp.asarray(target, jnp.float32) - pos
    zaxis = zaxis / jnp.linalg.norm(zaxis)
    up = jnp.array([0.0, 0.0, 1.0], jnp.float32)
    xaxis = jnp.cross(zaxis, up)
    xaxis = xaxis / jnp.linalg.norm(xaxis)
    yaxis = jnp.cross(zaxis, xaxis)
    R = jnp.stack([xaxis, yaxis, zaxis], axis=0)
    return {"R": R, "T": pos, "f": jnp.asarray(f, jnp.float32), "c": jnp.asarray(c, jnp.float32)}


# ----------------------------------------------------------------------------
# Pure-JAX reference (grid_sample align_corners=True, zeros padding)
# ----------------------------------------------------------------------------
def reference_forward(heatmaps, sample_grids, voxels_per_axis):
    B, N, J, H, W = heatmaps.shape

    def sample_one(hm, grid):                                          # hm (J,H,W), grid (nbins,2)
        x = (grid[:, 0] + 1.0) * 0.5 * (W - 1)
        y = (grid[:, 1] + 1.0) * 0.5 * (H - 1)
        x0 = jnp.floor(x).astype(jnp.int32)
        y0 = jnp.floor(y).astype(jnp.int32)
        x1, y1 = x0 + 1, y0 + 1
        wx1 = x - x0.astype(jnp.float32)
        wx0 = 1.0 - wx1
        wy1 = y - y0.astype(jnp.float32)
        wy0 = 1.0 - wy1

        def gather(xi, yi):
            valid = ((xi >= 0) & (xi < W) & (yi >= 0) & (yi < H)).astype(jnp.float32)
            v = hm[:, jnp.clip(yi, 0, H - 1), jnp.clip(xi, 0, W - 1)]  # (J, nbins)
            return v * valid[None, :]

        return (gather(x0, y0) * (wx0 * wy0)[None, :]
                + gather(x1, y0) * (wx1 * wy0)[None, :]
                + gather(x0, y1) * (wx0 * wy1)[None, :]
                + gather(x1, y1) * (wx1 * wy1)[None, :])               # (J, nbins)

    per_batch = jax.vmap(
        lambda hm_b: jnp.mean(jax.vmap(sample_one)(hm_b, sample_grids), axis=0))(heatmaps)
    vx, vy, vz = voxels_per_axis
    return jnp.clip(per_batch, 0.0, 1.0).reshape(B, J, vx, vy, vz)


# ----------------------------------------------------------------------------
if __name__ == "__main__":
    # cfg-equivalent constants (small test sizes)
    space_size = [2000.0, 2000.0, 2000.0]
    space_center = [0.0, 0.0, 1000.0]
    voxels_per_axis = [8, 8, 8]           # nbins = 512
    image_size = [64, 64]
    heatmap_size = [16, 16]               # (w, h)
    ori_wh = (128, 96)

    B, N, J = 2, 3, 8
    H, W = heatmap_size[1], heatmap_size[0]

    key = jax.random.PRNGKey(0)
    heatmaps = jax.random.uniform(key, (B, N, J, H, W), dtype=jnp.float32)

    # affine resize transform: ori image (128x96) -> network image (64x64)
    resize_transform = jnp.array(
        [[image_size[0] / ori_wh[0], 0.0, 0.0],
         [0.0, image_size[1] / ori_wh[1], 0.0]], jnp.float32)

    # cached sampling grid (self.sample_grid[seq] in the PyTorch module)
    grid3d = compute_grid(space_size, space_center, voxels_per_axis)
    cams = [make_camera(2.0 * jnp.pi * c / N, space_center, f=(60.0, 60.0), c=(64.0, 48.0))
            for c in range(N)]
    sample_grids = jnp.stack(
        [project_grid(grid3d, cam, image_size, heatmap_size, ori_wh, resize_transform)
         for cam in cams], axis=0)                                     # (N, nbins, 2)

    ref = reference_forward(heatmaps, sample_grids, voxels_per_axis)

    # f32 path (tile policy chosen automatically per chip generation)
    cubes = project_layer_forward(heatmaps, sample_grids, voxels_per_axis)
    cubes = jax.block_until_ready(cubes)
    assert cubes.shape == (B, J, *voxels_per_axis), cubes.shape
    assert jnp.allclose(cubes, ref, atol=1e-4, rtol=1e-4), \
        float(jnp.max(jnp.abs(cubes - ref)))

    # bf16 MXU path (~2-3x matmul + half heatmap DMA); relaxed tolerance.
    cubes_bf16 = jax.block_until_ready(
        project_layer_forward(heatmaps, sample_grids, voxels_per_axis, use_bf16=True))
    assert jnp.allclose(cubes_bf16, ref, atol=2e-2, rtol=2e-2), \
        float(jnp.max(jnp.abs(cubes_bf16 - ref)))

    print("KERNEL_OK")
</pallas_src>

<mosaic_0001>
module attributes {stable_mosaic.version = 11 : i64} {
  func.func @_project_kernel(%arg0: i32, %arg1: i32, %arg2: memref<1x256x16xf32, #tpu.memory_space<vmem>>, %arg3: memref<1x16x512xf32, #tpu.memory_space<vmem>>, %arg4: memref<1x16x512xf32, #tpu.memory_space<vmem>>, %arg5: memref<16x512xf32, #tpu.memory_space<vmem>>, %arg6: memref<16x512xf32, #tpu.memory_space<vmem>>) attributes {dimension_semantics = [#tpu.dimension_semantics<parallel>, #tpu.dimension_semantics<arbitrary>], iteration_bounds = array<i64: 1, 3>, scalar_prefetch = 0 : i64, scratch_operands = 1 : i64, tpu.core_type = #tpu.core_type<tc>, window_params = [{transform_indices = @transform_0, window_bounds = array<i64: 1, 256, 16>}, {transform_indices = @transform_1, window_bounds = array<i64: 1, 16, 512>}, {transform_indices = @transform_2, window_bounds = array<i64: 1, 16, 512>}, {transform_indices = @transform_3, window_bounds = array<i64: 16, 512>}]} {
    %c0_i32 = arith.constant 0 : i32
    %0 = arith.cmpi eq, %arg1, %c0_i32 : i32
    %1 = arith.extui %0 : i1 to i32
    %c0_i32_0 = arith.constant 0 : i32
    %2 = arith.cmpi ne, %1, %c0_i32_0 : i32
    scf.if %2 {
      %cst_15 = arith.constant 0.000000e+00 : f32
      %21 = vector.broadcast %cst_15 : f32 to vector<16x512xf32>
      %c0_16 = arith.constant 0 : index
      %c0_17 = arith.constant 0 : index
      %22 = vector.load %arg6[%c0_16, %c0_17] : memref<16x512xf32, #tpu.memory_space<vmem>>, vector<16x512xf32>
      tpu.vector_store %arg6[%c0_16, %c0_17], %21 {strides = array<i32>} : memref<16x512xf32, #tpu.memory_space<vmem>>, vector<16x512xf32>,
    } else {
    }
    %c0 = arith.constant 0 : index
    %c0_1 = arith.constant 0 : index
    %c0_2 = arith.constant 0 : index
    %3 = vector.load %arg2[%c0, %c0_1, %c0_2] : memref<1x256x16xf32, #tpu.memory_space<vmem>>, vector<1x256x16xf32>
    %4 = vector.shape_cast %3 : vector<1x256x16xf32> to vector<256x16xf32>
    %c0_3 = arith.constant 0 : index
    %c0_4 = arith.constant 0 : index
    %c0_5 = arith.constant 0 : index
    %5 = vector.load %arg3[%c0_3, %c0_4, %c0_5] : memref<1x16x512xf32, #tpu.memory_space<vmem>>, vector<1x16x512xf32>
    %6 = vector.shape_cast %5 : vector<1x16x512xf32> to vector<16x512xf32>
    %c0_6 = arith.constant 0 : index
    %c0_7 = arith.constant 0 : index
    %c0_8 = arith.constant 0 : index
    %7 = vector.load %arg4[%c0_6, %c0_7, %c0_8] : memref<1x16x512xf32, #tpu.memory_space<vmem>>, vector<1x16x512xf32>
    %8 = vector.shape_cast %7 : vector<1x16x512xf32> to vector<16x512xf32>
    %cst = arith.constant dense<0.000000e+00> : vector<256x512xf32>
    %9 = tpu.matmul %4, %6, %cst {dimension_numbers = #tpu.dot_dimension_numbers<[1], [0], [0], [1], [0, 0, 1, 1], [], []>} : vector<256x16xf32>, vector<16x512xf32>, vector<256x512xf32> -> vector<256x512xf32>
    %c0_9 = arith.constant 0 : index
    %c0_10 = arith.constant 0 : index
    %10 = vector.load %arg6[%c0_9, %c0_10] : memref<16x512xf32, #tpu.memory_space<vmem>>, vector<16x512xf32>
    %11 = vector.shape_cast %9 : vector<256x512xf32> to vector<16x16x512xf32>
    %12 = vector.shape_cast %8 : vector<16x512xf32> to vector<1x16x512xf32>
    %13 = vector.broadcast %12 : vector<1x16x512xf32> to vector<16x16x512xf32>
    %14 = arith.mulf %11, %13 : vector<16x16x512xf32>
    %cst_11 = arith.constant dense<0.000000e+00> : vector<16x512xf32>
    %15 = vector.multi_reduction <add>, %14, %cst_11 [1] : vector<16x16x512xf32> to vector<16x512xf32>
    %16 = arith.addf %10, %15 : vector<16x512xf32>
    %c0_12 = arith.constant 0 : index
    %c0_13 = arith.constant 0 : index
    %17 = vector.load %arg6[%c0_12, %c0_13] : memref<16x512xf32, #tpu.memory_space<vmem>>, vector<16x512xf32>
    tpu.vector_store %arg6[%c0_12, %c0_13], %16 {strides = array<i32>} : memref<16x512xf32, #tpu.memory_space<vmem>>, vector<16x512xf32>,
    %c2_i32 = arith.constant 2 : i32
    %18 = arith.cmpi eq, %arg1, %c2_i32 : i32
    %19 = arith.extui %18 : i1 to i32
    %c0_i32_14 = arith.constant 0 : i32
    %20 = arith.cmpi ne, %19, %c0_i32_14 : i32
    scf.if %20 {
      %c0_15 = arith.constant 0 : index
      %c0_16 = arith.constant 0 : index
      %21 = vector.load %arg6[%c0_15, %c0_16] : memref<16x512xf32, #tpu.memory_space<vmem>>, vector<16x512xf32>
      %cst_17 = arith.constant 0.000000e+00 : f32
      %cst_18 = arith.constant 1.000000e+00 : f32
      %22 = vector.broadcast %cst_17 : f32 to vector<16x512xf32>
      %23 = arith.maximumf %22, %21 : vector<16x512xf32>
      %24 = vector.broadcast %cst_18 : f32 to vector<16x512xf32>
      %25 = arith.minimumf %24, %23 : vector<16x512xf32>
      %c0_19 = arith.constant 0 : index
      %c0_20 = arith.constant 0 : index
      %26 = vector.load %arg5[%c0_19, %c0_20] : memref<16x512xf32, #tpu.memory_space<vmem>>, vector<16x512xf32>
      tpu.vector_store %arg5[%c0_19, %c0_20], %25 {strides = array<i32>} : memref<16x512xf32, #tpu.memory_space<vmem>>, vector<16x512xf32>,
    } else {
    }
    return
  }
  func.func @transform_0(%arg0: i32, %arg1: i32) -> (i32, i32, i32) {
    %c0_i32 = arith.constant 0 : i32
    %c0_i32_0 = arith.constant 0 : i32
    %c0_i32_1 = arith.constant 0 : i32
    return %arg1, %c0_i32, %c0_i32_0 : i32, i32, i32
  }
  func.func @transform_1(%arg0: i32, %arg1: i32) -> (i32, i32, i32) {
    %c0_i32 = arith.constant 0 : i32
    %c0_i32_0 = arith.constant 0 : i32
    return %arg1, %c0_i32, %arg0 : i32, i32, i32
  }
  func.func @transform_2(%arg0: i32, %arg1: i32) -> (i32, i32, i32) {
    %c0_i32 = arith.constant 0 : i32
    %c0_i32_0 = arith.constant 0 : i32
    return %arg1, %c0_i32, %arg0 : i32, i32, i32
  }
  func.func @transform_3(%arg0: i32, %arg1: i32) -> (i32, i32) {
    %c0_i32 = arith.constant 0 : i32
    %c0_i32_0 = arith.constant 0 : i32
    return %c0_i32, %arg0 : i32, i32
  }
}

</mosaic_0001>

<bundles_post_ra>
// kernel: tpu_custom_call.1
= control target key start
LH: loop header
LB: loop body
LE: loop exit
PB: predicated region body
PF: predicated region fallthrough
CT: control target
= control target key end

     0   :  { %8 = vsyncpa [#allocation4], 0  ;;  %s2000_s12 = smov 0   ;;  %s2002_s13 = smov 0   ;;  %s2701_s0 = inlined_call_operand.vmem [shape: f32[3,256,16], index: 0, kind: input, shape index: {}]   ;;  %s2702_s1 = inlined_call_operand.vmem [shape: f32[3,16,512], index: 1, kind: input, shape index: {}]   ;;  %s2703_s2 = inlined_call_operand.vmem [shape: f32[3,16,512], index: 2, kind: input, shape index: {}]   ;;  %s2704_s3 = inlined_call_operand.hbm [shape: f32[16,512], index: 3, kind: output, shape index: {}]  }
   0x1   :  { %s2004_s14 = smov 0  }
   0x2 LB: > { %s1787_s15 = sadd.s32 4294967295, %s1973_s14   ;;  %s23_s16 = sadd.s32 1, %s1969_s13  ;;  %s1973_s14 = sphi %s2004_s14, %s14_s14   ;;  %s1969_s13 = sphi %s2002_s13, %s2713_s13   ;;  %s1965_s12 = sphi %s2000_s12, %s2712_s12  }
   0x3   : > { %p24_p0 = scmp.ge.s32.totalorder %s23_s16, 3  ;;  %p1790_p1 = scmp.ge.s32.totalorder %s1973_s14, 1 }
   0x4   : > { %p184_p2 = scmp.lt.s32.totalorder %s1973_s14, 4 }
   0x5   : > { %s2715_s16 = smov (%p24_p0, %s23_s16), 0 }
   0x6   : > { %p185_p3 = pnand %p1790_p1, %p184_p2 }
   0x8   : > { %188 = sbr.rel (%p185_p3) target bundleno = 459 (0x1cb), region = 32 }
   0xf   : > { %p221_p4 = scmp.lt.s32.totalorder %s1965_s12, 2  ;;  %p1797_p5 = scmp.ne.s32.totalorder %s1965_s12, 0 }
  0x10   : > { %v1975_v0 = vmov (!%p1797_p5), 0.0  }
  0x11   : > { %s222_s17 = scalar_select %p221_p4, %s1965_s12, 2 }
  0x12   : > { %250 = sbr.rel (%p1797_p5) target bundleno = 25 (0x19), region = 36  ;;  %251 = vst [vmem:[#allocation2] sm:$0xff] (!%p1797_p5), %v1975_v0  ;;  %252 = vst [vmem:[#allocation2 + $0x8] sm:$0xff] (!%p1797_p5), %v1975_v0 }
  0x13   : > { %s1867_s18 = sshll.u32 %s222_s17, 8  ;;  %s1868_s19 = sshll.u32 %s222_s17, 6  ;;  %253 = vst [vmem:[#allocation2 + $0x10] sm:$0xff] (!%p1797_p5), %v1975_v0  ;;  %254 = vst [vmem:[#allocation2 + $0x18] sm:$0xff] (!%p1797_p5), %v1975_v0 }
  0x14   : > { %s2026_s22 = scalar_lea.vmem %s2701_s0, %s1867_s18  ;;  %s234_s25 = scalar_lea.vmem %s2702_s1, %s1868_s19  ;;  %255 = vst [vmem:[#allocation2 + $0x20] sm:$0xff] (!%p1797_p5), %v1975_v0  ;;  %256 = vst [vmem:[#allocation2 + $0x28] sm:$0xff] (!%p1797_p5), %v1975_v0 }
  0x15   : > { %s2034_s28 = scalar_lea.vmem %s2703_s2, %s1868_s19  ;;  %257 = vst [vmem:[#allocation2 + $0x30] sm:$0xff] (!%p1797_p5), %v1975_v0  ;;  %258 = vst [vmem:[#allocation2 + $0x38] sm:$0xff] (!%p1797_p5), %v1975_v0 }
  0x19 PF: > { %v292_v1 = vld [vmem:[%s234_s25 + $0x8] sm:$0xff]  ;;  %v294_v3 = vld [vmem:[%s234_s25 + $0x18] sm:$0xff]  ;;  %v291_v6 = vld [vmem:[%s234_s25] sm:$0xff]  ;;  %v1976_v8 = vmov 0.0   ;;  %vm307_vm0 = vcmask 130048   ;;  %vm1566_vm1 = vcmask 1041409  }
  0x1a   : > { %v296_v2 = vld [vmem:[%s234_s25 + $0x28] sm:$0xff]  ;;  %v298_v5 = vld [vmem:[%s234_s25 + $0x38] sm:$0xff]  ;;  %v295_v7 = vld [vmem:[%s234_s25 + $0x20] sm:$0xff]  ;;  %468 = vmatprep.mubr.f32.mxu0 %v1976_v8  ;;  %725 = vmatprep.mubr.f32.mxu1 %v1976_v8  ;;  %vm1568_vm2 = vcmask 1042434   ;;  %vm1570_vm3 = vcmask 1043459   ;;  %vm1572_vm4 = vcmask 1044484  }
  0x1b   : > { %v1870_v4 = vpack.c.bf16 %v296_v2, %v292_v1  ;;  %v1874_v9 = vpack.c.bf16 %v298_v5, %v294_v3  ;;  %v1872_v10 = vpack.c.bf16 %v295_v7, %v291_v6  ;;  %v293_v11 = vld [vmem:[%s234_s25 + $0x10] sm:$0xff]  ;;  %v259_v14 = vld [vmem:[%s2026_s22] sm:$0xff]  ;;  %v260_v15 = vld [vmem:[%s2026_s22 + $0x8] sm:$0xff]  ;;  %vm1574_vm5 = vcmask 1045509   ;;  %p1862_p6 = scmp.ne.s32.totalorder %s1965_s12, 2 }
  0x1c   : > { %v297_v12 = vld [vmem:[%s234_s25 + $0x30] sm:$0xff]  ;;  %v262_v17 = vld [vmem:[%s2026_s22 + $0x18] sm:$0xff]  ;;  %v263_v18 = vld [vmem:[%s2026_s22 + $0x20] sm:$0xff]  ;;  %vm1576_vm6 = vcmask 1046534   ;;  %vm1578_vm7 = vcmask 1047559  }
  0x1d   : > { %1871 = vmatprep.subr.bf16.mxu0 %v1870_v4  ;;  %v1876_v13 = vpack.c.bf16 %v297_v12, %v293_v11  ;;  %1875 = vmatprep.subr.bf16.mxu1 %v1874_v9  ;;  %v261_v16 = vld [vmem:[%s2026_s22 + $0x10] sm:$0xff]  ;;  %v264_v19 = vld [vmem:[%s2026_s22 + $0x28] sm:$0xff]  ;;  %v266_v21 = vld [vmem:[%s2026_s22 + $0x38] sm:$0xff] }
  0x1e   : > { %1873 = vmatpush1.bf16.msra.mxu0 %v1872_v10  ;;  %v265_v20 = vld [vmem:[%s2026_s22 + $0x30] sm:$0xff]  ;;  %v267_v22 = vld [vmem:[%s2026_s22 + $0x40] sm:$0xff]  ;;  %v268_v23 = vld [vmem:[%s2026_s22 + $0x48] sm:$0xff] }
  0x1f   : > { %1877 = vmatpush1.bf16.msra.mxu1 %v1876_v13  ;;  %v269_v24 = vld [vmem:[%s2026_s22 + $0x50] sm:$0xff]  ;;  %v270_v25 = vld [vmem:[%s2026_s22 + $0x58] sm:$0xff]  ;;  %v271_v26 = vld [vmem:[%s2026_s22 + $0x60] sm:$0xff] }
  0x20   : > { %v272_v27 = vld [vmem:[%s2026_s22 + $0x68] sm:$0xff]  ;;  %v273_v28 = vld [vmem:[%s2026_s22 + $0x70] sm:$0xff]  ;;  %v274_v29 = vld [vmem:[%s2026_s22 + $0x78] sm:$0xff] }
  0x21   : > { %1798 = vmatmul.mubr.msk.f32.vlgmr.msra.gmra.mrb[0].mxu0 %vm307_vm0, %v259_v14  ;;  %v275_v30 = vld [vmem:[%s2026_s22 + $0x80] sm:$0xff]  ;;  %v276_v31 = vld [vmem:[%s2026_s22 + $0x88] sm:$0xff]  ;;  %v277_v32 = vld [vmem:[%s2026_s22 + $0x90] sm:$0xff] }
  0x22   : > { %1830 = vmatmul.mubr.msk.f32.vlgmr.msra.gmra.mrb[0].mxu1 %vm307_vm0, %v259_v14  ;;  %474 = vmatprep.mubr.f32.mxu0 %v1976_v8  ;;  %v278_v33 = vld [vmem:[%s2026_s22 + $0x98] sm:$0xff]  ;;  %v279_v34 = vld [vmem:[%s2026_s22 + $0xa0] sm:$0xff]  ;;  %v280_v35 = vld [vmem:[%s2026_s22 + $0xa8] sm:$0xff] }
  0x23   : > { %731 = vmatprep.mubr.f32.mxu1 %v1976_v8  ;;  %v281_v36 = vld [vmem:[%s2026_s22 + $0xb0] sm:$0xff]  ;;  %v282_v37 = vld [vmem:[%s2026_s22 + $0xb8] sm:$0xff]  ;;  %v283_v38 = vld [vmem:[%s2026_s22 + $0xc0] sm:$0xff] }
  0x24   : > { %v284_v39 = vld [vmem:[%s2026_s22 + $0xc8] sm:$0xff]  ;;  %v285_v40 = vld [vmem:[%s2026_s22 + $0xd0] sm:$0xff]  ;;  %v286_v41 = vld [vmem:[%s2026_s22 + $0xd8] sm:$0xff] }
  0x25   : > { %1799 = vmatmul.mubr.msk.f32.gmra.mrb[2].mxu0 %vm307_vm0, %v260_v15  ;;  %v287_v42 = vld [vmem:[%s2026_s22 + $0xe0] sm:$0xff]  ;;  %v288_v43 = vld [vmem:[%s2026_s22 + $0xe8] sm:$0xff]  ;;  %v289_v44 = vld [vmem:[%s2026_s22 + $0xf0] sm:$0xff] }
  0x26   : > { %1831 = vmatmul.mubr.msk.f32.gmra.mrb[2].mxu1 %vm307_vm0, %v260_v15  ;;  %480 = vmatprep.mubr.f32.mxu0 %v1976_v8  ;;  %v290_v45 = vld [vmem:[%s2026_s22 + $0xf8] sm:$0xff]  ;;  %v2198_v49 = vld [vmem:[%s2034_s28] sm:$0xff]  ;;  %v2201_v50 = vld [vmem:[%s2034_s28 + $0x10] sm:$0xff] }
  0x27   : > { %737 = vmatprep.mubr.f32.mxu1 %v1976_v8  ;;  %v2204_v52 = vld [vmem:[%s2034_s28 + $0x20] sm:$0xff]  ;;  %v2207_v53 = vld [vmem:[%s2034_s28 + $0x8] sm:$0xff]  ;;  %v2210_v54 = vld [vmem:[%s2034_s28 + $0x30] sm:$0xff] }
  0x28   : > { %v2213_v55 = vld [vmem:[%s2034_s28 + $0x28] sm:$0xff]  ;;  %v2216_v56 = vld [vmem:[%s2034_s28 + $0x18] sm:$0xff] }
  0x29   : > { %1800 = vmatmul.mubr.msk.f32.gmra.mrb[4].mxu0 %vm307_vm0, %v261_v16  ;;  %v2219_v58 = vld [vmem:[%s2034_s28 + $0x38] sm:$0xff] }
  0x2a   : > { %1832 = vmatmul.mubr.msk.f32.gmra.mrb[4].mxu1 %vm307_vm0, %v261_v16  ;;  %486 = vmatprep.mubr.f32.mxu0 %v1976_v8 }
  0x2b   : > { %743 = vmatprep.mubr.f32.mxu1 %v1976_v8 }
  0x2d   : > { %1801 = vmatmul.mubr.msk.f32.gmra.mrb[6].mxu0 %vm307_vm0, %v262_v17 }
  0x2e   : > { %1833 = vmatmul.mubr.msk.f32.gmra.mrb[6].mxu1 %vm307_vm0, %v262_v17  ;;  %492 = vmatprep.mubr.f32.mxu0 %v1976_v8 }
  0x2f   : > { %749 = vmatprep.mubr.f32.mxu1 %v1976_v8 }
  0x31   : > { %1802 = vmatmul.mubr.msk.f32.gmra.mrb[8].mxu0 %vm307_vm0, %v263_v18 }
  0x32   : > { %1834 = vmatmul.mubr.msk.f32.gmra.mrb[8].mxu1 %vm307_vm0, %v263_v18  ;;  %498 = vmatprep.mubr.f32.mxu0 %v1976_v8 }
  0x33   : > { %755 = vmatprep.mubr.f32.mxu1 %v1976_v8 }
  0x35   : > { %1803 = vmatmul.mubr.msk.f32.gmra.mrb[10].mxu0 %vm307_vm0, %v264_v19 }
  0x36   : > { %1835 = vmatmul.mubr.msk.f32.gmra.mrb[10].mxu1 %vm307_vm0, %v264_v19  ;;  %504 = vmatprep.mubr.f32.mxu0 %v1976_v8 }
  0x37   : > { %761 = vmatprep.mubr.f32.mxu1 %v1976_v8 }
  0x39   : > { %1804 = vmatmul.mubr.msk.f32.gmra.mrb[12].mxu0 %vm307_vm0, %v265_v20 }
  0x3a   : > { %1836 = vmatmul.mubr.msk.f32.gmra.mrb[12].mxu1 %vm307_vm0, %v265_v20  ;;  %510 = vmatprep.mubr.f32.mxu0 %v1976_v8 }
  0x3b   : > { %767 = vmatprep.mubr.f32.mxu1 %v1976_v8 }
  0x3d   : > { %1805 = vmatmul.mubr.msk.f32.gmra.mrb[14].mxu0 %vm307_vm0, %v266_v21 }
  0x3e   : > { %1837 = vmatmul.mubr.msk.f32.gmra.mrb[14].mxu1 %vm307_vm0, %v266_v21  ;;  %516 = vmatprep.mubr.f32.mxu0 %v1976_v8 }
  0x3f   : > { %773 = vmatprep.mubr.f32.mxu1 %v1976_v8 }
  0x41   : > { %1806 = vmatmul.mubr.msk.f32.gmra.mrb[16].mxu0 %vm307_vm0, %v267_v22 }
  0x42   : > { %1838 = vmatmul.mubr.msk.f32.gmra.mrb[16].mxu1 %vm307_vm0, %v267_v22  ;;  %522 = vmatprep.mubr.f32.mxu0 %v1976_v8 }
  0x43   : > { %779 = vmatprep.mubr.f32.mxu1 %v1976_v8 }
  0x45   : > { %1807 = vmatmul.mubr.msk.f32.gmra.mrb[18].mxu0 %vm307_vm0, %v268_v23 }
  0x46   : > { %1839 = vmatmul.mubr.msk.f32.gmra.mrb[18].mxu1 %vm307_vm0, %v268_v23  ;;  %528 = vmatprep.mubr.f32.mxu0 %v1976_v8 }
  0x47   : > { %785 = vmatprep.mubr.f32.mxu1 %v1976_v8 }
  0x49   : > { %1808 = vmatmul.mubr.msk.f32.gmra.mrb[20].mxu0 %vm307_vm0, %v269_v24 }
  0x4a   : > { %1840 = vmatmul.mubr.msk.f32.gmra.mrb[20].mxu1 %vm307_vm0, %v269_v24  ;;  %534 = vmatprep.mubr.f32.mxu0 %v1976_v8 }
  0x4b   : > { %791 = vmatprep.mubr.f32.mxu1 %v1976_v8 }
  0x4d   : > { %1809 = vmatmul.mubr.msk.f32.gmra.mrb[22].mxu0 %vm307_vm0, %v270_v25 }
  0x4e   : > { %1841 = vmatmul.mubr.msk.f32.gmra.mrb[22].mxu1 %vm307_vm0, %v270_v25  ;;  %540 = vmatprep.mubr.f32.mxu0 %v1976_v8 }
  0x4f   : > { %797 = vmatprep.mubr.f32.mxu1 %v1976_v8 }
  0x51   : > { %1810 = vmatmul.mubr.msk.f32.gmra.mrb[24].mxu0 %vm307_vm0, %v271_v26 }
  0x52   : > { %1842 = vmatmul.mubr.msk.f32.gmra.mrb[24].mxu1 %vm307_vm0, %v271_v26  ;;  %546 = vmatprep.mubr.f32.mxu0 %v1976_v8 }
  0x53   : > { %803 = vmatprep.mubr.f32.mxu1 %v1976_v8 }
  0x55   : > { %1811 = vmatmul.mubr.msk.f32.gmra.mrb[26].mxu0 %vm307_vm0, %v272_v27 }
  0x56   : > { %1843 = vmatmul.mubr.msk.f32.gmra.mrb[26].mxu1 %vm307_vm0, %v272_v27  ;;  %552 = vmatprep.mubr.f32.mxu0 %v1976_v8 }
  0x57   : > { %809 = vmatprep.mubr.f32.mxu1 %v1976_v8 }
  0x59   : > { %1812 = vmatmul.mubr.msk.f32.gmra.mrb[28].mxu0 %vm307_vm0, %v273_v28 }
  0x5a   : > { %1844 = vmatmul.mubr.msk.f32.gmra.mrb[28].mxu1 %vm307_vm0, %v273_v28  ;;  %558 = vmatprep.mubr.f32.mxu0 %v1976_v8 }
  0x5b   : > { %815 = vmatprep.mubr.f32.mxu1 %v1976_v8 }
  0x5d   : > { %1813 = vmatmul.mubr.msk.f32.gmra.mrb[30].mxu0 %vm307_vm0, %v274_v29 }
  0x5e   : > { %1845 = vmatmul.mubr.msk.f32.gmra.mrb[30].mxu1 %vm307_vm0, %v274_v29  ;;  %564 = vmatprep.mubr.f32.mxu0 %v1976_v8 }
  0x5f   : > { %821 = vmatprep.mubr.f32.mxu1 %v1976_v8 }
  0x61   : > { %1814 = vmatmul.mubr.msk.f32.gmra.mrb[32].mxu0 %vm307_vm0, %v275_v30 }
  0x62   : > { %1846 = vmatmul.mubr.msk.f32.gmra.mrb[32].mxu1 %vm307_vm0, %v275_v30  ;;  %570 = vmatprep.mubr.f32.mxu0 %v1976_v8 }
  0x63   : > { %827 = vmatprep.mubr.f32.mxu1 %v1976_v8 }
  0x65   : > { %1815 = vmatmul.mubr.msk.f32.gmra.mrb[34].mxu0 %vm307_vm0, %v276_v31 }
  0x66   : > { %1847 = vmatmul.mubr.msk.f32.gmra.mrb[34].mxu1 %vm307_vm0, %v276_v31  ;;  %576 = vmatprep.mubr.f32.mxu0 %v1976_v8 }
  0x67   : > { %833 = vmatprep.mubr.f32.mxu1 %v1976_v8 }
  0x69   : > { %1816 = vmatmul.mubr.msk.f32.gmra.mrb[36].mxu0 %vm307_vm0, %v277_v32 }
  0x6a   : > { %1848 = vmatmul.mubr.msk.f32.gmra.mrb[36].mxu1 %vm307_vm0, %v277_v32  ;;  %582 = vmatprep.mubr.f32.mxu0 %v1976_v8 }
  0x6b   : > { %839 = vmatprep.mubr.f32.mxu1 %v1976_v8 }
  0x6d   : > { %1817 = vmatmul.mubr.msk.f32.gmra.mrb[38].mxu0 %vm307_vm0, %v278_v33 }
  0x6e   : > { %1849 = vmatmul.mubr.msk.f32.gmra.mrb[38].mxu1 %vm307_vm0, %v278_v33  ;;  %588 = vmatprep.mubr.f32.mxu0 %v1976_v8 }
  0x6f   : > { %845 = vmatprep.mubr.f32.mxu1 %v1976_v8 }
  0x71   : > { %1818 = vmatmul.mubr.msk.f32.gmra.mrb[40].mxu0 %vm307_vm0, %v279_v34 }
  0x72   : > { %1850 = vmatmul.mubr.msk.f32.gmra.mrb[40].mxu1 %vm307_vm0, %v279_v34  ;;  %594 = vmatprep.mubr.f32.mxu0 %v1976_v8 }
  0x73   : > { %851 = vmatprep.mubr.f32.mxu1 %v1976_v8 }
  0x75   : > { %1819 = vmatmul.mubr.msk.f32.gmra.mrb[42].mxu0 %vm307_vm0, %v280_v35 }
  0x76   : > { %1851 = vmatmul.mubr.msk.f32.gmra.mrb[42].mxu1 %vm307_vm0, %v280_v35  ;;  %600 = vmatprep.mubr.f32.mxu0 %v1976_v8 }
  0x77   : > { %857 = vmatprep.mubr.f32.mxu1 %v1976_v8 }
  0x79   : > { %1820 = vmatmul.mubr.msk.f32.gmra.mrb[44].mxu0 %vm307_vm0, %v281_v36 }
  0x7a   : > { %1852 = vmatmul.mubr.msk.f32.gmra.mrb[44].mxu1 %vm307_vm0, %v281_v36  ;;  %606 = vmatprep.mubr.f32.mxu0 %v1976_v8 }
  0x7b   : > { %863 = vmatprep.mubr.f32.mxu1 %v1976_v8 }
  0x7d   : > { %1821 = vmatmul.mubr.msk.f32.gmra.mrb[46].mxu0 %vm307_vm0, %v282_v37 }
  0x7e   : > { %1853 = vmatmul.mubr.msk.f32.gmra.mrb[46].mxu1 %vm307_vm0, %v282_v37  ;;  %612 = vmatprep.mubr.f32.mxu0 %v1976_v8 }
  0x7f   : > { %869 = vmatprep.mubr.f32.mxu1 %v1976_v8 }
  0x81   : > { %1822 = vmatmul.mubr.msk.f32.gmra.mrb[48].mxu0 %vm307_vm0, %v283_v38 }
  0x82   : > { %1854 = vmatmul.mubr.msk.f32.gmra.mrb[48].mxu1 %vm307_vm0, %v283_v38  ;;  %618 = vmatprep.mubr.f32.mxu0 %v1976_v8 }
  0x83   : > { %875 = vmatprep.mubr.f32.mxu1 %v1976_v8 }
  0x85   : > { %1823 = vmatmul.mubr.msk.f32.gmra.mrb[50].mxu0 %vm307_vm0, %v284_v39 }
  0x86   : > { %1855 = vmatmul.mubr.msk.f32.gmra.mrb[50].mxu1 %vm307_vm0, %v284_v39  ;;  %624 = vmatprep.mubr.f32.mxu0 %v1976_v8 }
  0x87   : > { %881 = vmatprep.mubr.f32.mxu1 %v1976_v8 }
  0x89   : > { %1824 = vmatmul.mubr.msk.f32.gmra.mrb[52].mxu0 %vm307_vm0, %v285_v40 }
  0x8a   : > { %1856 = vmatmul.mubr.msk.f32.gmra.mrb[52].mxu1 %vm307_vm0, %v285_v40  ;;  %630 = vmatprep.mubr.f32.mxu0 %v1976_v8 }
  0x8b   : > { %887 = vmatprep.mubr.f32.mxu1 %v1976_v8 }
  0x8d   : > { %1825 = vmatmul.mubr.msk.f32.gmra.mrb[54].mxu0 %vm307_vm0, %v286_v41 }
  0x8e   : > { %1857 = vmatmul.mubr.msk.f32.gmra.mrb[54].mxu1 %vm307_vm0, %v286_v41  ;;  %636 = vmatprep.mubr.f32.mxu0 %v1976_v8 }
  0x8f   : > { %893 = vmatprep.mubr.f32.mxu1 %v1976_v8 }
  0x91   : > { %1826 = vmatmul.mubr.msk.f32.gmra.mrb[56].mxu0 %vm307_vm0, %v287_v42 }
  0x92   : > { %1858 = vmatmul.mubr.msk.f32.gmra.mrb[56].mxu1 %vm307_vm0, %v287_v42  ;;  %642 = vmatprep.mubr.f32.mxu0 %v1976_v8 }
  0x93   : > { %899 = vmatprep.mubr.f32.mxu1 %v1976_v8 }
  0x95   : > { %1827 = vmatmul.mubr.msk.f32.gmra.mrb[58].mxu0 %vm307_vm0, %v288_v43 }
  0x96   : > { %1859 = vmatmul.mubr.msk.f32.gmra.mrb[58].mxu1 %vm307_vm0, %v288_v43  ;;  %648 = vmatprep.mubr.f32.mxu0 %v1976_v8 }
  0x97   : > { %905 = vmatprep.mubr.f32.mxu1 %v1976_v8 }
  0x99   : > { %1828 = vmatmul.mubr.msk.f32.gmra.mrb[60].mxu0 %vm307_vm0, %v289_v44 }
  0x9a   : > { %1860 = vmatmul.mubr.msk.f32.gmra.mrb[60].mxu1 %vm307_vm0, %v289_v44  ;;  %654 = vmatprep.mubr.f32.mxu0 %v1976_v8 }
  0x9b   : > { %911 = vmatprep.mubr.f32.mxu1 %v1976_v8 }
  0x9d   : > { %1829 = vmatmul.mubr.msk.f32.gmra.mrb[62].mxu0 %vm307_vm0, %v290_v45 }
  0x9e   : > { %1861 = vmatmul.mubr.msk.f32.gmra.mrb[62].mxu1 %vm307_vm0, %v290_v45 }
  0xf4   : > { %v470_v46 = vpop.f32.mrb[0].mxu0 }
  0xf5   : > { %v727_v47 = vpop.f32.mrb[0].mxu1  ;;  %v472_v48 = vpop.f32.mrb[1].mxu0  ;;  %v926_v59 = vmul.f32 %v470_v46, %v2198_v49 }
  0xf6   : > { %v729_v51 = vpop.f32.mrb[1].mxu1  ;;  %v928_v63 = vmul.f32 %v727_v47, %v2201_v50  ;;  %v927_v0 = vmul.f32 %v472_v48, %v2207_v53 }
  0xf7   : > { %v929_v4 = vmul.f32 %v729_v51, %v2216_v56 }
  0xf8   : > { %v476_v57 = vpop.f32.mrb[2].mxu0 }
  0xf9   : > { %v930_v60 = vmul.f32 %v476_v57, %v2204_v52  ;;  %v733_v61 = vpop.f32.mrb[2].mxu1  ;;  %v478_v62 = vpop.f32.mrb[3].mxu0 }
  0xfa   : > { %v932_v1 = vmul.f32 %v733_v61, %v2210_v54  ;;  %v931_v2 = vmul.f32 %v478_v62, %v2213_v55  ;;  %v735_v3 = vpop.f32.mrb[3].mxu1 }
  0xfb   : > { %v1054_v5 = vadd.f32 %v930_v60, %v926_v59  ;;  %v933_v6 = vmul.f32 %v735_v3, %v2219_v58 }
  0xfc   : > { %v1068_v7 = vadd.f32 %v932_v1, %v928_v63  ;;  %v1061_v8 = vadd.f32 %v931_v2, %v927_v0  ;;  %v482_v9 = vpop.f32.mrb[4].mxu0 }
  0xfd   : > { %v1055_v10 = vrot.slane %v1054_v5, 4  ;;  %v1075_v11 = vadd.f32 %v933_v6, %v929_v4  ;;  %v739_v12 = vpop.f32.mrb[4].mxu1  ;;  %v484_v13 = vpop.f32.mrb[5].mxu0  ;;  %v934_v19 = vmul.f32 %v482_v9, %v2198_v49 }
  0xfe   : > { %v1069_v14 = vrot.slane %v1068_v7, 4  ;;  %v1062_v15 = vrot.slane %v1061_v8, 4  ;;  %v741_v16 = vpop.f32.mrb[5].mxu1  ;;  %v936_v22 = vmul.f32 %v739_v12, %v2201_v50  ;;  %v935_v23 = vmul.f32 %v484_v13, %v2207_v53 }
  0xff   : > { %v1056_v17 = vadd.f32 %v1055_v10, %v1054_v5  ;;  %v1076_v18 = vrot.slane %v1075_v11, 4  ;;  %v937_v27 = vmul.f32 %v741_v16, %v2216_v56 }
 0x100   : > { %v1070_v20 = vadd.f32 %v1069_v14, %v1068_v7  ;;  %v1063_v21 = vadd.f32 %v1062_v15, %v1061_v8  ;;  %v488_v24 = vpop.f32.mrb[6].mxu0 }
 0x101   : > { %v1057_v25 = vrot.slane %v1056_v17, 2  ;;  %v1077_v26 = vadd.f32 %v1076_v18, %v1075_v11  ;;  %v938_v28 = vmul.f32 %v488_v24, %v2204_v52  ;;  %v745_v29 = vpop.f32.mrb[6].mxu1  ;;  %v490_v30 = vpop.f32.mrb[7].mxu0 }
 0x102   : > { %v1071_v31 = vrot.slane %v1070_v20, 2  ;;  %v1064_v32 = vrot.slane %v1063_v21, 2  ;;  %v940_v33 = vmul.f32 %v745_v29, %v2210_v54  ;;  %v939_v34 = vmul.f32 %v490_v30, %v2213_v55  ;;  %v747_v35 = vpop.f32.mrb[7].mxu1 }
 0x103   : > { %v1058_v36 = vadd.f32 %v1057_v25, %v1056_v17  ;;  %v1078_v37 = vrot.slane %v1077_v26, 2  ;;  %v1082_v38 = vadd.f32 %v938_v28, %v934_v19  ;;  %v941_v39 = vmul.f32 %v747_v35, %v2219_v58 }
 0x104   : > { %v1072_v40 = vadd.f32 %v1071_v31, %v1070_v20  ;;  %v1065_v41 = vadd.f32 %v1064_v32, %v1063_v21  ;;  %v1096_v42 = vadd.f32 %v940_v33, %v936_v22  ;;  %v1089_v43 = vadd.f32 %v939_v34, %v935_v23  ;;  %v494_v44 = vpop.f32.mrb[8].mxu0 }
 0x105   : > { %v1059_v45 = vrot.slane %v1058_v36, 1  ;;  %v1079_v46 = vadd.f32 %v1078_v37, %v1077_v26  ;;  %v1083_v47 = vrot.slane %v1082_v38, 4  ;;  %v1103_v48 = vadd.f32 %v941_v39, %v937_v27  ;;  %v751_v51 = vpop.f32.mrb[8].mxu1  ;;  %v496_v57 = vpop.f32.mrb[9].mxu0 }
 0x106   : > { %v1073_v59 = vrot.slane %v1072_v40, 1  ;;  %v1066_v60 = vrot.slane %v1065_v41, 1  ;;  %v1097_v61 = vrot.slane %v1096_v42, 4  ;;  %v1090_v62 = vrot.slane %v1089_v43, 4  ;;  %v753_v63 = vpop.f32.mrb[9].mxu1 }
 0x107   : > { %v1060_v0 = vadd.f32 %v1059_v45, %v1058_v36  ;;  %v1080_v1 = vrot.slane %v1079_v46, 1  ;;  %v1084_v2 = vadd.f32 %v1083_v47, %v1082_v38  ;;  %v1104_v3 = vrot.slane %v1103_v48, 4 }
 0x108   : > { %v1074_v4 = vadd.f32 %v1073_v59, %v1072_v40  ;;  %v1067_v5 = vadd.f32 %v1066_v60, %v1065_v41  ;;  %v1098_v6 = vadd.f32 %v1097_v61, %v1096_v42  ;;  %v1091_v7 = vadd.f32 %v1090_v62, %v1089_v43  ;;  %v500_v8 = vpop.f32.mrb[10].mxu0 }
 0x109   : > { %v1081_v9 = vadd.f32 %v1080_v1, %v1079_v46  ;;  %v1085_v10 = vrot.slane %v1084_v2, 2  ;;  %v1105_v11 = vadd.f32 %v1104_v3, %v1103_v48  ;;  %v942_v12 = vmul.f32 %v494_v44, %v2198_v49  ;;  %v757_v13 = vpop.f32.mrb[10].mxu1  ;;  %v502_v14 = vpop.f32.mrb[11].mxu0 }
 0x10a   : > { %v1099_v15 = vrot.slane %v1098_v6, 2  ;;  %v1092_v16 = vrot.slane %v1091_v7, 2  ;;  %v944_v17 = vmul.f32 %v751_v51, %v2201_v50  ;;  %v943_v18 = vmul.f32 %v496_v57, %v2207_v53  ;;  %v759_v19 = vpop.f32.mrb[11].mxu1 }
 0x10b   : > { %v1086_v20 = vadd.f32 %v1085_v10, %v1084_v2  ;;  %v1106_v21 = vrot.slane %v1105_v11, 2  ;;  %v945_v22 = vmul.f32 %v753_v63, %v2216_v56  ;;  %v946_v23 = vmul.f32 %v500_v8, %v2204_v52 }
 0x10c   : > { %v1100_v24 = vadd.f32 %v1099_v15, %v1098_v6  ;;  %v1093_v25 = vadd.f32 %v1092_v16, %v1091_v7  ;;  %v948_v26 = vmul.f32 %v757_v13, %v2210_v54  ;;  %v947_v27 = vmul.f32 %v502_v14, %v2213_v55  ;;  %v506_v28 = vpop.f32.mrb[12].mxu0 }
 0x10d   : > { %v1087_v29 = vrot.slane %v1086_v20, 1  ;;  %v1107_v30 = vadd.f32 %v1106_v21, %v1105_v11  ;;  %v1110_v31 = vadd.f32 %v946_v23, %v942_v12  ;;  %v949_v32 = vmul.f32 %v759_v19, %v2219_v58  ;;  %v763_v33 = vpop.f32.mrb[12].mxu1  ;;  %v508_v34 = vpop.f32.mrb[13].mxu0 }
 0x10e   : > { %v1101_v35 = vrot.slane %v1100_v24, 1  ;;  %v1094_v36 = vrot.slane %v1093_v25, 1  ;;  %v1124_v37 = vadd.f32 %v948_v26, %v944_v17  ;;  %v1117_v38 = vadd.f32 %v947_v27, %v943_v18  ;;  %v765_v39 = vpop.f32.mrb[13].mxu1 }
 0x10f   : > { %v1088_v40 = vadd.f32 %v1087_v29, %v1086_v20  ;;  %v1108_v41 = vrot.slane %v1107_v30, 1  ;;  %v1111_v42 = vrot.slane %v1110_v31, 4  ;;  %v1131_v43 = vadd.f32 %v949_v32, %v945_v22 }
 0x110   : > { %v1102_v44 = vadd.f32 %v1101_v35, %v1100_v24  ;;  %v1095_v45 = vadd.f32 %v1094_v36, %v1093_v25  ;;  %v1125_v46 = vrot.slane %v1124_v37, 4  ;;  %v1118_v47 = vrot.slane %v1117_v38, 4  ;;  %v512_v48 = vpop.f32.mrb[14].mxu0 }
 0x111   : > { %v1567_v51 = vsel %vm1566_vm1, %v1088_v40, %v1060_v0  ;;  %v1109_v57 = vadd.f32 %v1108_v41, %v1107_v30  ;;  %v1112_v59 = vadd.f32 %v1111_v42, %v1110_v31  ;;  %v1132_v60 = vrot.slane %v1131_v43, 4  ;;  %v769_v61 = vpop.f32.mrb[14].mxu1  ;;  %v514_v62 = vpop.f32.mrb[15].mxu0 }
 0x112   : > { %v1587_v63 = vsel %vm1566_vm1, %v1102_v44, %v1074_v4  ;;  %v1580_v1 = vsel %vm1566_vm1, %v1095_v45, %v1067_v5  ;;  %v1126_v2 = vadd.f32 %v1125_v46, %v1124_v37  ;;  %v1119_v3 = vadd.f32 %v1118_v47, %v1117_v38  ;;  %v771_v6 = vpop.f32.mrb[15].mxu1 }
 0x113   : > { %v1594_v7 = vsel %vm1566_vm1, %v1109_v57, %v1081_v9  ;;  %v1113_v8 = vrot.slane %v1112_v59, 2  ;;  %v1133_v10 = vadd.f32 %v1132_v60, %v1131_v43  ;;  %v950_v11 = vmul.f32 %v506_v28, %v2198_v49 }
 0x114   : > { %v1127_v12 = vrot.slane %v1126_v2, 2  ;;  %v1120_v0 = vrot.slane %v1119_v3, 2  ;;  %v952_v13 = vmul.f32 %v763_v33, %v2201_v50  ;;  %v951_v14 = vmul.f32 %v508_v34, %v2207_v53  ;;  %v518_v15 = vpop.f32.mrb[16].mxu0 }
 0x115   : > { %v1114_v16 = vadd.f32 %v1113_v8, %v1112_v59  ;;  %v1134_v4 = vrot.slane %v1133_v10, 2  ;;  %v953_v5 = vmul.f32 %v765_v39, %v2216_v56  ;;  %v954_v17 = vmul.f32 %v512_v48, %v2204_v52  ;;  %v775_v18 = vpop.f32.mrb[16].mxu1  ;;  %v520_v19 = vpop.f32.mrb[17].mxu0 }
 0x116   : > { %v1128_v9 = vadd.f32 %v1127_v12, %v1126_v2  ;;  %v1121_v20 = vadd.f32 %v1120_v0, %v1119_v3  ;;  %v956_v21 = vmul.f32 %v769_v61, %v2210_v54  ;;  %v955_v22 = vmul.f32 %v514_v62, %v2213_v55  ;;  %v777_v23 = vpop.f32.mrb[17].mxu1 }
 0x117   : > { %v1115_v24 = vrot.slane %v1114_v16, 1  ;;  %v1135_v25 = vadd.f32 %v1134_v4, %v1133_v10  ;;  %v1138_v26 = vadd.f32 %v954_v17, %v950_v11  ;;  %v957_v27 = vmul.f32 %v771_v6, %v2219_v58 }
 0x118   : > { %v1129_v28 = vrot.slane %v1128_v9, 1  ;;  %v1122_v29 = vrot.slane %v1121_v20, 1  ;;  %v1152_v30 = vadd.f32 %v956_v21, %v952_v13  ;;  %v1145_v31 = vadd.f32 %v955_v22, %v951_v14  ;;  %v524_v32 = vpop.f32.mrb[18].mxu0 }
 0x119   : > { %v1116_v33 = vadd.f32 %v1115_v24, %v1114_v16  ;;  %v1136_v34 = vrot.slane %v1135_v25, 1  ;;  %v1139_v35 = vrot.slane %v1138_v26, 4  ;;  %v1159_v36 = vadd.f32 %v957_v27, %v953_v5  ;;  %v781_v37 = vpop.f32.mrb[18].mxu1  ;;  %v526_v38 = vpop.f32.mrb[19].mxu0 }
 0x11a   : > { %v1130_v39 = vadd.f32 %v1129_v28, %v1128_v9  ;;  %v1123_v40 = vadd.f32 %v1122_v29, %v1121_v20  ;;  %v1153_v41 = vrot.slane %v1152_v30, 4  ;;  %v1146_v42 = vrot.slane %v1145_v31, 4  ;;  %v783_v43 = vpop.f32.mrb[19].mxu1 }
 0x11b   : > { %v1569_v44 = vsel %vm1568_vm2, %v1116_v33, %v1567_v51  ;;  %v1137_v45 = vadd.f32 %v1136_v34, %v1135_v25  ;;  %v1140_v46 = vadd.f32 %v1139_v35, %v1138_v26  ;;  %v1160_v47 = vrot.slane %v1159_v36, 4 }
 0x11c   : > { %v1588_v48 = vsel %vm1568_vm2, %v1130_v39, %v1587_v63  ;;  %v1581_v57 = vsel %vm1568_vm2, %v1123_v40, %v1580_v1  ;;  %v1154_v59 = vadd.f32 %v1153_v41, %v1152_v30  ;;  %v1147_v60 = vadd.f32 %v1146_v42, %v1145_v31  ;;  %v530_v61 = vpop.f32.mrb[20].mxu0 }
 0x11d   : > { %v1595_v62 = vsel %vm1568_vm2, %v1137_v45, %v1594_v7  ;;  %v1141_v2 = vrot.slane %v1140_v46, 2  ;;  %v1161_v3 = vadd.f32 %v1160_v47, %v1159_v36  ;;  %v958_v6 = vmul.f32 %v518_v15, %v2198_v49  ;;  %v787_v8 = vpop.f32.mrb[20].mxu1  ;;  %v532_v10 = vpop.f32.mrb[21].mxu0 }
 0x11e   : > { %v1155_v11 = vrot.slane %v1154_v59, 2  ;;  %v1148_v51 = vrot.slane %v1147_v60, 2  ;;  %v960_v12 = vmul.f32 %v775_v18, %v2201_v50  ;;  %v959_v0 = vmul.f32 %v520_v19, %v2207_v53  ;;  %v789_v63 = vpop.f32.mrb[21].mxu1 }
 0x11f   : > { %v1142_v13 = vadd.f32 %v1141_v2, %v1140_v46  ;;  %v1162_v1 = vrot.slane %v1161_v3, 2  ;;  %v961_v14 = vmul.f32 %v777_v23, %v2216_v56  ;;  %v962_v16 = vmul.f32 %v524_v32, %v2204_v52 }
 0x120   : > { %v1156_v7 = vadd.f32 %v1155_v11, %v1154_v59  ;;  %v1149_v4 = vadd.f32 %v1148_v51, %v1147_v60  ;;  %v964_v5 = vmul.f32 %v781_v37, %v2210_v54  ;;  %v963_v15 = vmul.f32 %v526_v38, %v2213_v55  ;;  %v536_v17 = vpop.f32.mrb[22].mxu0 }
 0x121   : > { %v1143_v9 = vrot.slane %v1142_v13, 1  ;;  %v1163_v20 = vadd.f32 %v1162_v1, %v1161_v3  ;;  %v1166_v21 = vadd.f32 %v962_v16, %v958_v6  ;;  %v965_v18 = vmul.f32 %v783_v43, %v2219_v58  ;;  %v793_v19 = vpop.f32.mrb[22].mxu1  ;;  %v538_v22 = vpop.f32.mrb[23].mxu0 }
 0x122   : > { %v1157_v24 = vrot.slane %v1156_v7, 1  ;;  %v1150_v25 = vrot.slane %v1149_v4, 1  ;;  %v1180_v26 = vadd.f32 %v964_v5, %v960_v12  ;;  %v1173_v23 = vadd.f32 %v963_v15, %v959_v0  ;;  %v795_v27 = vpop.f32.mrb[23].mxu1 }
 0x123   : > { %v1144_v28 = vadd.f32 %v1143_v9, %v1142_v13  ;;  %v1164_v29 = vrot.slane %v1163_v20, 1  ;;  %v1167_v30 = vrot.slane %v1166_v21, 4  ;;  %v1187_v31 = vadd.f32 %v965_v18, %v961_v14 }
 0x124   : > { %v1158_v32 = vadd.f32 %v1157_v24, %v1156_v7  ;;  %v1151_v33 = vadd.f32 %v1150_v25, %v1149_v4  ;;  %v1181_v34 = vrot.slane %v1180_v26, 4  ;;  %v1174_v35 = vrot.slane %v1173_v23, 4  ;;  %v2269_v36 = vpop.f32.mrb[24].mxu0 }
 0x125   : > { %v1571_v37 = vsel %vm1570_vm3, %v1144_v28, %v1569_v44  ;;  %v1165_v38 = vadd.f32 %v1164_v29, %v1163_v20  ;;  %v1168_v39 = vadd.f32 %v1167_v30, %v1166_v21  ;;  %v1188_v40 = vrot.slane %v1187_v31, 4  ;;  %v2272_v41 = vpop.f32.mrb[24].mxu1  ;;  %v2274_v42 = vpop.f32.mrb[25].mxu0 }
 0x126   : > { %v1589_v43 = vsel %vm1570_vm3, %v1158_v32, %v1588_v48  ;;  %v1582_v45 = vsel %vm1570_vm3, %v1151_v33, %v1581_v57  ;;  %v1182_v46 = vadd.f32 %v1181_v34, %v1180_v26  ;;  %v1175_v47 = vadd.f32 %v1174_v35, %v1173_v23  ;;  %v2278_v59 = vpop.f32.mrb[25].mxu1 }
 0x127   : > { %v1596_v60 = vsel %vm1570_vm3, %v1165_v38, %v1595_v62  ;;  %v1169_v2 = vrot.slane %v1168_v39, 2  ;;  %v1189_v3 = vadd.f32 %v1188_v40, %v1187_v31  ;;  %v966_v44 = vmul.f32 %v530_v61, %v2198_v49 }
 0x128   : > { %v1183_v6 = vrot.slane %v1182_v46, 2  ;;  %v1176_v11 = vrot.slane %v1175_v47, 2  ;;  %v968_v51 = vmul.f32 %v787_v8, %v2201_v50  ;;  %v967_v12 = vmul.f32 %v532_v10, %v2207_v53  ;;  %v548_v0 = vpop.f32.mrb[26].mxu0 }
 0x129   : > { %v1170_v48 = vadd.f32 %v1169_v2, %v1168_v39  ;;  %v1190_v13 = vrot.slane %v1189_v3, 2  ;;  %v969_v57 = vmul.f32 %v789_v63, %v2216_v56  ;;  %v970_v1 = vmul.f32 %v536_v17, %v2204_v52  ;;  %v805_v14 = vpop.f32.mrb[26].mxu1  ;;  %v550_v16 = vpop.f32.mrb[27].mxu0 }
 0x12a   : > { %v1184_v62 = vadd.f32 %v1183_v6, %v1182_v46  ;;  %v1177_v7 = vadd.f32 %v1176_v11, %v1175_v47  ;;  %v972_v4 = vmul.f32 %v793_v19, %v2210_v54  ;;  %v971_v61 = vmul.f32 %v538_v22, %v2213_v55  ;;  %v807_v5 = vpop.f32.mrb[27].mxu1 }
 0x12b   : > { %v1171_v15 = vrot.slane %v1170_v48, 1  ;;  %v1191_v8 = vadd.f32 %v1190_v13, %v1189_v3  ;;  %v1194_v9 = vadd.f32 %v970_v1, %v966_v44  ;;  %v973_v10 = vmul.f32 %v795_v27, %v2219_v58 }
 0x12c   : > { %v1185_v20 = vrot.slane %v1184_v62, 1  ;;  %v1178_v21 = vrot.slane %v1177_v7, 1  ;;  %v1208_v18 = vadd.f32 %v972_v4, %v968_v51  ;;  %v1201_v63 = vadd.f32 %v971_v61, %v967_v12  ;;  %v2289_v24 = vpop.f32.mrb[28].mxu0 }
 0x12d   : > { %v1172_v17 = vadd.f32 %v1171_v15, %v1170_v48  ;;  %v1192_v25 = vrot.slane %v1191_v8, 1  ;;  %v1195_v26 = vrot.slane %v1194_v9, 4  ;;  %v1215_v23 = vadd.f32 %v973_v10, %v969_v57  ;;  %v2291_v28 = vpop.f32.mrb[28].mxu1  ;;  %v2293_v19 = vpop.f32.mrb[29].mxu0 }
 0x12e   : > { %v1186_v22 = vadd.f32 %v1185_v20, %v1184_v62  ;;  %v1179_v29 = vadd.f32 %v1178_v21, %v1177_v7  ;;  %v1209_v30 = vrot.slane %v1208_v18, 4  ;;  %v1202_v31 = vrot.slane %v1201_v63, 4  ;;  %v2295_v27 = vpop.f32.mrb[29].mxu1 }
 0x12f   : > { %v1573_v32 = vsel %vm1572_vm4, %v1172_v17, %v1571_v37  ;;  %v1193_v33 = vadd.f32 %v1192_v25, %v1191_v8  ;;  %v1196_v34 = vadd.f32 %v1195_v26, %v1194_v9  ;;  %v1216_v35 = vrot.slane %v1215_v23, 4 }
 0x130   : > { %v1590_v38 = vsel %vm1572_vm4, %v1186_v22, %v1589_v43  ;;  %v1583_v39 = vsel %vm1572_vm4, %v1179_v29, %v1582_v45  ;;  %v1210_v40 = vadd.f32 %v1209_v30, %v1208_v18  ;;  %v1203_v46 = vadd.f32 %v1202_v31, %v1201_v63  ;;  %v2300_v47 = vpop.f32.mrb[30].mxu0 }
 0x131   : > { %v1597_v2 = vsel %vm1572_vm4, %v1193_v33, %v1596_v60  ;;  %v1197_v3 = vrot.slane %v1196_v34, 2  ;;  %v1217_v44 = vadd.f32 %v1216_v35, %v1215_v23  ;;  %v974_v6 = vmul.f32 %v2269_v36, %v2198_v49  ;;  %v2305_v11 = vpop.f32.mrb[30].mxu1  ;;  %v2307_v37 = vpop.f32.mrb[31].mxu0 }
 0x132   : > { %v1211_v51 = vrot.slane %v1210_v40, 2  ;;  %v1204_v12 = vrot.slane %v1203_v46, 2  ;;  %v976_v43 = vmul.f32 %v2272_v41, %v2201_v50  ;;  %v975_v45 = vmul.f32 %v2274_v42, %v2207_v53  ;;  %v2313_v48 = vpop.f32.mrb[31].mxu1 }
 0x133   : > { %v1198_v60 = vadd.f32 %v1197_v3, %v1196_v34  ;;  %v1218_v13 = vrot.slane %v1217_v44, 2  ;;  %v977_v57 = vmul.f32 %v2278_v59, %v2216_v56  ;;  %v978_v36 = vmul.f32 %v548_v0, %v2204_v52 }
 0x134   : > { %v1212_v1 = vadd.f32 %v1211_v51, %v1210_v40  ;;  %v1205_v62 = vadd.f32 %v1204_v12, %v1203_v46  ;;  %v980_v7 = vmul.f32 %v805_v14, %v2210_v54  ;;  %v979_v4 = vmul.f32 %v550_v16, %v2213_v55  ;;  %v2320_v61 = vpop.f32.mrb[32].mxu0 }
 0x135   : > { %v1199_v41 = vrot.slane %v1198_v60, 1  ;;  %v1219_v15 = vadd.f32 %v1218_v13, %v1217_v44  ;;  %v1222_v42 = vadd.f32 %v978_v36, %v974_v6  ;;  %v981_v8 = vmul.f32 %v807_v5, %v2219_v58  ;;  %v2323_v9 = vpop.f32.mrb[32].mxu1  ;;  %v2325_v10 = vpop.f32.mrb[33].mxu0 }
 0x136   : > { %v1213_v59 = vrot.slane %v1212_v1, 1  ;;  %v1206_v20 = vrot.slane %v1205_v62, 1  ;;  %v1236_v0 = vadd.f32 %v980_v7, %v976_v43  ;;  %v1229_v21 = vadd.f32 %v979_v4, %v975_v45  ;;  %v2327_v18 = vpop.f32.mrb[33].mxu1 }
 0x137   : > { %v1200_v14 = vadd.f32 %v1199_v41, %v1198_v60  ;;  %v1220_v63 = vrot.slane %v1219_v15, 1  ;;  %v1223_v16 = vrot.slane %v1222_v42, 4  ;;  %v1243_v17 = vadd.f32 %v981_v8, %v977_v57 }
 0x138   : > { %v1214_v25 = vadd.f32 %v1213_v59, %v1212_v1  ;;  %v1207_v26 = vadd.f32 %v1206_v20, %v1205_v62  ;;  %v1237_v23 = vrot.slane %v1236_v0, 4  ;;  %v1230_v22 = vrot.slane %v1229_v21, 4  ;;  %v2329_v5 = vpop.f32.mrb[34].mxu0 }
 0x139   : > { %v1575_v29 = vsel %vm1574_vm5, %v1200_v14, %v1573_v32  ;;  %v1221_v30 = vadd.f32 %v1220_v63, %v1219_v15  ;;  %v1224_v31 = vadd.f32 %v1223_v16, %v1222_v42  ;;  %v1244_v33 = vrot.slane %v1243_v17, 4  ;;  %v2332_v34 = vpop.f32.mrb[34].mxu1  ;;  %v2334_v35 = vpop.f32.mrb[35].mxu0 }
 0x13a   : > { %v1591_v40 = vsel %vm1574_vm5, %v1214_v25, %v1590_v38  ;;  %v1584_v46 = vsel %vm1574_vm5, %v1207_v26, %v1583_v39  ;;  %v1238_v3 = vadd.f32 %v1237_v23, %v1236_v0  ;;  %v1231_v44 = vadd.f32 %v1230_v22, %v1229_v21  ;;  %v2338_v6 = vpop.f32.mrb[35].mxu1 }
 0x13b   : > { %v1598_v51 = vsel %vm1574_vm5, %v1221_v30, %v1597_v2  ;;  %v1225_v12 = vrot.slane %v1224_v31, 2  ;;  %v1245_v43 = vadd.f32 %v1244_v33, %v1243_v17  ;;  %v982_v32 = vmul.f32 %v2289_v24, %v2198_v49 }
 0x13c   : > { %v1239_v45 = vrot.slane %v1238_v3, 2  ;;  %v1232_v60 = vrot.slane %v1231_v44, 2  ;;  %v984_v13 = vmul.f32 %v2291_v28, %v2201_v50  ;;  %v983_v38 = vmul.f32 %v2293_v19, %v2207_v53  ;;  %v2347_v39 = vpop.f32.mrb[36].mxu0 }
 0x13d   : > { %v1226_v57 = vadd.f32 %v1225_v12, %v1224_v31  ;;  %v1246_v36 = vrot.slane %v1245_v43, 2  ;;  %v985_v2 = vmul.f32 %v2295_v27, %v2216_v56  ;;  %v986_v1 = vmul.f32 %v2300_v47, %v2204_v52  ;;  %v2353_v62 = vpop.f32.mrb[36].mxu1  ;;  %v2355_v24 = vpop.f32.mrb[37].mxu0 }
 0x13e   : > { %v1240_v7 = vadd.f32 %v1239_v45, %v1238_v3  ;;  %v1233_v4 = vadd.f32 %v1232_v60, %v1231_v44  ;;  %v988_v28 = vmul.f32 %v2305_v11, %v2210_v54  ;;  %v987_v19 = vmul.f32 %v2307_v37, %v2213_v55  ;;  %v2361_v41 = vpop.f32.mrb[37].mxu1 }
 0x13f   : > { %v1227_v15 = vrot.slane %v1226_v57, 1  ;;  %v1247_v42 = vadd.f32 %v1246_v36, %v1245_v43  ;;  %v1250_v27 = vadd.f32 %v986_v1, %v982_v32  ;;  %v989_v47 = vmul.f32 %v2313_v48, %v2219_v58 }
 0x140   : > { %v1241_v8 = vrot.slane %v1240_v7, 1  ;;  %v1234_v59 = vrot.slane %v1233_v4, 1  ;;  %v1264_v20 = vadd.f32 %v988_v28, %v984_v13  ;;  %v1257_v0 = vadd.f32 %v987_v19, %v983_v38  ;;  %v2365_v21 = vpop.f32.mrb[38].mxu0 }
 0x141   : > { %v1228_v14 = vadd.f32 %v1227_v15, %v1226_v57  ;;  %v1248_v63 = vrot.slane %v1247_v42, 1  ;;  %v1251_v11 = vrot.slane %v1250_v27, 4  ;;  %v1271_v16 = vadd.f32 %v989_v47, %v985_v2  ;;  %v2367_v17 = vpop.f32.mrb[38].mxu1  ;;  %v2369_v37 = vpop.f32.mrb[39].mxu0 }
 0x142   : > { %v1242_v25 = vadd.f32 %v1241_v8, %v1240_v7  ;;  %v1235_v26 = vadd.f32 %v1234_v59, %v1233_v4  ;;  %v1265_v23 = vrot.slane %v1264_v20, 4  ;;  %v1258_v22 = vrot.slane %v1257_v0, 4  ;;  %v2371_v48 = vpop.f32.mrb[39].mxu1 }
 0x143   : > { %v1577_v30 = vsel %vm1576_vm6, %v1228_v14, %v1575_v29  ;;  %v1249_v31 = vadd.f32 %v1248_v63, %v1247_v42  ;;  %v1252_v33 = vadd.f32 %v1251_v11, %v1250_v27  ;;  %v1272_v3 = vrot.slane %v1271_v16, 4  ;;  %v918_v11 = vld [vmem:[#allocation2] sm:$0xff] }
 0x144   : > { %v1592_v44 = vsel %vm1576_vm6, %v1242_v25, %v1591_v40  ;;  %v1585_v12 = vsel %vm1576_vm6, %v1235_v26, %v1584_v46  ;;  %v1266_v43 = vadd.f32 %v1265_v23, %v1264_v20  ;;  %v1259_v32 = vadd.f32 %v1258_v22, %v1257_v0  ;;  %v2376_v45 = vpop.f32.mrb[40].mxu0  ;;  %v920_v23 = vld [vmem:[#allocation2 + $0x10] sm:$0xff] }
 0x145   : > { %v1599_v60 = vsel %vm1576_vm6, %v1249_v31, %v1598_v51  ;;  %v1253_v13 = vrot.slane %v1252_v33, 2  ;;  %v1273_v38 = vadd.f32 %v1272_v3, %v1271_v16  ;;  %v990_v57 = vmul.f32 %v2320_v61, %v2198_v49  ;;  %v2381_v36 = vpop.f32.mrb[40].mxu1  ;;  %v2383_v29 = vpop.f32.mrb[41].mxu0  ;;  %v919_v31 = vld [vmem:[#allocation2 + $0x8] sm:$0xff] }
 0x146   : > { %v1267_v2 = vrot.slane %v1266_v43, 2  ;;  %v1260_v1 = vrot.slane %v1259_v32, 2  ;;  %v992_v40 = vmul.f32 %v2323_v9, %v2201_v50  ;;  %v991_v46 = vmul.f32 %v2325_v10, %v2207_v53  ;;  %v2389_v7 = vpop.f32.mrb[41].mxu1 }
 0x147   : > { %v1254_v51 = vadd.f32 %v1253_v13, %v1252_v33  ;;  %v1274_v4 = vrot.slane %v1273_v38, 2  ;;  %v993_v28 = vmul.f32 %v2327_v18, %v2216_v56  ;;  %v994_v61 = vmul.f32 %v2329_v5, %v2204_v52  ;;  %v921_v13 = vld [vmem:[#allocation2 + $0x18] sm:$0xff] }
 0x148   : > { %v1268_v19 = vadd.f32 %v1267_v2, %v1266_v43  ;;  %v1261_v15 = vadd.f32 %v1260_v1, %v1259_v32  ;;  %v996_v42 = vmul.f32 %v2332_v34, %v2210_v54  ;;  %v995_v9 = vmul.f32 %v2334_v35, %v2213_v55  ;;  %v2399_v27 = vpop.f32.mrb[42].mxu0 }
 0x149   : > { %v1255_v10 = vrot.slane %v1254_v51, 1  ;;  %v1275_v47 = vadd.f32 %v1274_v4, %v1273_v38  ;;  %v1278_v8 = vadd.f32 %v994_v61, %v990_v57  ;;  %v997_v59 = vmul.f32 %v2338_v6, %v2219_v58  ;;  %v2403_v18 = vpop.f32.mrb[42].mxu1  ;;  %v2405_v20 = vpop.f32.mrb[43].mxu0 }
 0x14a   : > { %v1269_v5 = vrot.slane %v1268_v19, 1  ;;  %v1262_v0 = vrot.slane %v1261_v15, 1  ;;  %v1292_v14 = vadd.f32 %v996_v42, %v992_v40  ;;  %v1285_v63 = vadd.f32 %v995_v9, %v991_v46  ;;  %v2407_v34 = vpop.f32.mrb[43].mxu1 }
 0x14b   : > { %v1256_v35 = vadd.f32 %v1255_v10, %v1254_v51  ;;  %v1276_v16 = vrot.slane %v1275_v47, 1  ;;  %v1279_v25 = vrot.slane %v1278_v8, 4  ;;  %v1299_v26 = vadd.f32 %v997_v59, %v993_v28 }
 0x14c   : > { %v1270_v22 = vadd.f32 %v1269_v5, %v1268_v19  ;;  %v1263_v33 = vadd.f32 %v1262_v0, %v1261_v15  ;;  %v1293_v6 = vrot.slane %v1292_v14, 4  ;;  %v1286_v3 = vrot.slane %v1285_v63, 4  ;;  %v2409_v43 = vpop.f32.mrb[44].mxu0 }
 0x14d   : > { %v1579_v32 = vsel %vm1578_vm7, %v1256_v35, %v1577_v30  ;;  %v1277_v38 = vadd.f32 %v1276_v16, %v1275_v47  ;;  %v1280_v57 = vadd.f32 %v1279_v25, %v1278_v8  ;;  %v1300_v2 = vrot.slane %v1299_v26, 4  ;;  %v2412_v1 = vpop.f32.mrb[44].mxu1  ;;  %v2414_v40 = vpop.f32.mrb[45].mxu0 }
 0x14e   : > { %v1637_v46 = vadd.f32 %v1579_v32, %v918_v11  ;;  %v1593_v51 = vsel %vm1578_vm7, %v1270_v22, %v1592_v44  ;;  %v1586_v4 = vsel %vm1578_vm7, %v1263_v33, %v1585_v12  ;;  %v1294_v28 = vadd.f32 %v1293_v6, %v1292_v14  ;;  %v2418_v61 = vpop.f32.mrb[45].mxu1 }
 0x14f   : > { %v1639_v19 = vadd.f32 %v1593_v51, %v920_v23  ;;  %v1638_v15 = vadd.f32 %v1586_v4, %v919_v31  ;;  %v1600_v30 = vsel %vm1578_vm7, %v1277_v38, %v1599_v60  ;;  %v1281_v42 = vrot.slane %v1280_v57, 2 }
 0x150   : > { %1645 = vst [vmem:[#allocation2] sm:$0xff] %v1637_v46  ;;  %v1640_v9 = vadd.f32 %v1600_v30, %v921_v13  ;;  %v1295_v10 = vrot.slane %v1294_v28, 2  ;;  %v1287_v47 = vadd.f32 %v1286_v3, %v1285_v63  ;;  %v1301_v8 = vadd.f32 %v1300_v2, %v1299_v26  ;;  %v2421_v59 = vpop.f32.mrb[46].mxu0 }
 0x151   : > { %1647 = vst [vmem:[#allocation2 + $0x10] sm:$0xff] %v1639_v19  ;;  %1646 = vst [vmem:[#allocation2 + $0x8] sm:$0xff] %v1638_v15  ;;  %v1282_v44 = vadd.f32 %v1281_v42, %v1280_v57  ;;  %v998_v12 = vmul.f32 %v2347_v39, %v2198_v49  ;;  %v1000_v5 = vmul.f32 %v2353_v62, %v2201_v50  ;;  %v2429_v0 = vpop.f32.mrb[46].mxu1  ;;  %v2431_v14 = vpop.f32.mrb[47].mxu0 }
 0x152   : > { %v999_v60 = vmul.f32 %v2355_v24, %v2207_v53  ;;  %1648 = vst [vmem:[#allocation2 + $0x18] sm:$0xff] %v1640_v9  ;;  %v1296_v63 = vadd.f32 %v1295_v10, %v1294_v28  ;;  %v1288_v11 = vrot.slane %v1287_v47, 2  ;;  %v1302_v35 = vrot.slane %v1301_v8, 2  ;;  %v2435_v25 = vpop.f32.mrb[47].mxu1 }
 0x153   : > { %v1001_v16 = vmul.f32 %v2361_v41, %v2216_v56  ;;  %v1283_v39 = vrot.slane %v1282_v44, 1  ;;  %v1002_v62 = vmul.f32 %v2365_v21, %v2204_v52  ;;  %v1004_v24 = vmul.f32 %v2367_v17, %v2210_v54 }
 0x154   : > { %v1003_v26 = vmul.f32 %v2369_v37, %v2213_v55  ;;  %v1297_v23 = vrot.slane %v1296_v63, 1  ;;  %v1289_v22 = vadd.f32 %v1288_v11, %v1287_v47  ;;  %v1303_v31 = vadd.f32 %v1302_v35, %v1301_v8  ;;  %v2445_v6 = vpop.f32.mrb[48].mxu0 }
 0x155   : > { %v1005_v33 = vmul.f32 %v2371_v48, %v2219_v58  ;;  %v2447_v41 = vadd.f32 %v1283_v39, %v1282_v44  ;;  %v1306_v3 = vadd.f32 %v1002_v62, %v998_v12  ;;  %v1320_v32 = vadd.f32 %v1004_v24, %v1000_v5  ;;  %v2449_v21 = vpop.f32.mrb[48].mxu1  ;;  %v2451_v38 = vpop.f32.mrb[49].mxu0 }
 0x156   : > { %v1313_v13 = vadd.f32 %v1003_v26, %v999_v60  ;;  %v2453_v17 = vadd.f32 %v1297_v23, %v1296_v63  ;;  %v1290_v37 = vrot.slane %v1289_v22, 1  ;;  %v1304_v57 = vrot.slane %v1303_v31, 1  ;;  %v2455_v46 = vpop.f32.mrb[49].mxu1 }
 0x157   : > { %v1327_v2 = vadd.f32 %v1005_v33, %v1001_v16  ;;  %v1307_v51 = vrot.slane %v1306_v3, 4  ;;  %v1321_v48 = vrot.slane %v1320_v32, 4  ;;  %v1006_v28 = vmul.f32 %v2376_v45, %v2198_v49 }
 0x158   : > { %v1314_v4 = vrot.slane %v1313_v13, 4  ;;  %v1291_v19 = vadd.f32 %v1290_v37, %v1289_v22  ;;  %v1305_v15 = vadd.f32 %v1304_v57, %v1303_v31  ;;  %v1008_v42 = vmul.f32 %v2381_v36, %v2201_v50  ;;  %v2461_v9 = vpop.f32.mrb[50].mxu0 }
 0x159   : > { %v1328_v30 = vrot.slane %v1327_v2, 4  ;;  %v1308_v10 = vadd.f32 %v1307_v51, %v1306_v3  ;;  %v1322_v47 = vadd.f32 %v1321_v48, %v1320_v32  ;;  %v1007_v44 = vmul.f32 %v2383_v29, %v2207_v53  ;;  %v2465_v12 = vpop.f32.mrb[50].mxu1  ;;  %v2467_v5 = vpop.f32.mrb[51].mxu0 }
 0x15a   : > { %v1315_v8 = vadd.f32 %v1314_v4, %v1313_v13  ;;  %v1009_v49 = vmul.f32 %v2389_v7, %v2216_v56  ;;  %v1010_v45 = vmul.f32 %v2399_v27, %v2204_v52  ;;  %v1012_v50 = vmul.f32 %v2403_v18, %v2210_v54  ;;  %v2475_v36 = vpop.f32.mrb[51].mxu1 }
 0x15b   : > { %v1329_v60 = vadd.f32 %v1328_v30, %v1327_v2  ;;  %v1309_v63 = vrot.slane %v1308_v10, 2  ;;  %v1323_v11 = vrot.slane %v1322_v47, 2  ;;  %v1011_v53 = vmul.f32 %v2405_v20, %v2213_v55 }
 0x15c   : > { %v1316_v35 = vrot.slane %v1315_v8, 2  ;;  %v1334_v16 = vadd.f32 %v1010_v45, %v1006_v28  ;;  %v1348_v39 = vadd.f32 %v1012_v50, %v1008_v42  ;;  %v1013_v56 = vmul.f32 %v2407_v34, %v2219_v58  ;;  %v2481_v7 = vpop.f32.mrb[52].mxu0 }
 0x15d   : > { %v1330_v29 = vrot.slane %v1329_v60, 2  ;;  %v1310_v52 = vadd.f32 %v1309_v63, %v1308_v10  ;;  %v1324_v27 = vadd.f32 %v1323_v11, %v1322_v47  ;;  %v1341_v54 = vadd.f32 %v1011_v53, %v1007_v44  ;;  %v2483_v18 = vpop.f32.mrb[52].mxu1  ;;  %v2485_v24 = vpop.f32.mrb[53].mxu0 }
 0x15e   : > { %v1317_v62 = vadd.f32 %v1316_v35, %v1315_v8  ;;  %v1335_v23 = vrot.slane %v1334_v16, 4  ;;  %v1349_v22 = vrot.slane %v1348_v39, 4  ;;  %v1355_v55 = vadd.f32 %v1013_v56, %v1009_v49  ;;  %v2487_v20 = vpop.f32.mrb[53].mxu1 }
 0x15f   : > { %v1331_v26 = vadd.f32 %v1330_v29, %v1329_v60  ;;  %v1311_v31 = vrot.slane %v1310_v52, 1  ;;  %v1325_v33 = vrot.slane %v1324_v27, 1  ;;  %v1342_v58 = vrot.slane %v1341_v54, 4 }
 0x160   : > { %v1318_v3 = vrot.slane %v1317_v62, 1  ;;  %v1336_v32 = vadd.f32 %v1335_v23, %v1334_v16  ;;  %v1350_v13 = vadd.f32 %v1349_v22, %v1348_v39  ;;  %v1356_v37 = vrot.slane %v1355_v55, 4  ;;  %v2489_v57 = vpop.f32.mrb[54].mxu0  ;;  %v2506_v39 = vld [vmem:[%s2034_s28] sm:$0xff] }
 0x161   : > { %v1332_v34 = vrot.slane %v1331_v26, 1  ;;  %v1312_v2 = vadd.f32 %v1311_v31, %v1310_v52  ;;  %v1326_v51 = vadd.f32 %v1325_v33, %v1324_v27  ;;  %v1343_v4 = vadd.f32 %v1342_v58, %v1341_v54  ;;  %v2491_v28 = vpop.f32.mrb[54].mxu1  ;;  %v2493_v30 = vpop.f32.mrb[55].mxu0  ;;  %v2537_v31 = vld [vmem:[%s2034_s28 + $0x30] sm:$0xff] }
 0x162   : > { %v1319_v48 = vadd.f32 %v1318_v3, %v1317_v62  ;;  %v1337_v10 = vrot.slane %v1336_v32, 2  ;;  %v1351_v47 = vrot.slane %v1350_v13, 2  ;;  %v1357_v8 = vadd.f32 %v1356_v37, %v1355_v55  ;;  %v2495_v44 = vpop.f32.mrb[55].mxu1  ;;  %v2532_v55 = vld [vmem:[%s2034_s28 + $0x20] sm:$0xff]  ;;  %v2542_v3 = vld [vmem:[%s2034_s28 + $0x28] sm:$0xff] }
 0x163   : > { %v1333_v42 = vadd.f32 %v1332_v34, %v1331_v26  ;;  %v1601_v60 = vsel %vm1566_vm1, %v1312_v2, %v2447_v41  ;;  %v1615_v49 = vsel %vm1566_vm1, %v1326_v51, %v2453_v17  ;;  %v1344_v50 = vrot.slane %v1343_v4, 2  ;;  %v2511_v17 = vld [vmem:[%s2034_s28 + $0x10] sm:$0xff]  ;;  %v2525_v26 = vld [vmem:[%s2034_s28 + $0x18] sm:$0xff] }
 0x164   : > { %v1608_v45 = vsel %vm1566_vm1, %v1319_v48, %v1291_v19  ;;  %v1338_v11 = vadd.f32 %v1337_v10, %v1336_v32  ;;  %v1352_v35 = vadd.f32 %v1351_v47, %v1350_v13  ;;  %v1358_v53 = vrot.slane %v1357_v8, 2  ;;  %v2503_v29 = vpop.f32.mrb[56].mxu0  ;;  %v2547_v13 = vld [vmem:[%s2034_s28 + $0x38] sm:$0xff] }
 0x165   : > { %v1622_v63 = vsel %vm1566_vm1, %v1333_v42, %v1305_v15  ;;  %v1345_v16 = vadd.f32 %v1344_v50, %v1343_v4  ;;  %v1014_v41 = vmul.f32 %v2506_v39, %v2409_v43  ;;  %v1016_v19 = vmul.f32 %v2511_v17, %v2412_v1  ;;  %v2516_v15 = vld [vmem:[%s2034_s28 + $0x8] sm:$0xff]  ;;  %v2520_v52 = vpop.f32.mrb[56].mxu1  ;;  %v2522_v27 = vpop.f32.mrb[57].mxu0 }
 0x166   : > { %v1015_v56 = vmul.f32 %v2516_v15, %v2414_v40  ;;  %v1339_v62 = vrot.slane %v1338_v11, 1  ;;  %v1353_v54 = vrot.slane %v1352_v35, 1  ;;  %v1359_v43 = vadd.f32 %v1358_v53, %v1357_v8  ;;  %v2529_v1 = vpop.f32.mrb[57].mxu1 }
 0x167   : > { %v1017_v23 = vmul.f32 %v2525_v26, %v2418_v61  ;;  %v1346_v22 = vrot.slane %v1345_v16, 1  ;;  %v1018_v40 = vmul.f32 %v2532_v55, %v2421_v59  ;;  %v1020_v33 = vmul.f32 %v2537_v31, %v2429_v0 }
 0x168   : > { %v1019_v58 = vmul.f32 %v2542_v3, %v2431_v14  ;;  %v1340_v34 = vadd.f32 %v1339_v62, %v1338_v11  ;;  %v1354_v61 = vadd.f32 %v1353_v54, %v1352_v35  ;;  %v1360_v32 = vrot.slane %v1359_v43, 1  ;;  %v2551_v2 = vpop.f32.mrb[58].mxu0 }
 0x169   : > { %v1021_v37 = vmul.f32 %v2547_v13, %v2435_v25  ;;  %v1347_v59 = vadd.f32 %v1346_v22, %v1345_v16  ;;  %v1362_v51 = vadd.f32 %v1018_v40, %v1014_v41  ;;  %v1376_v48 = vadd.f32 %v1020_v33, %v1016_v19  ;;  %v2553_v0 = vpop.f32.mrb[58].mxu1  ;;  %v2555_v42 = vpop.f32.mrb[59].mxu0 }
 0x16a   : > { %v1369_v4 = vadd.f32 %v1019_v58, %v1015_v56  ;;  %v1602_v14 = vsel %vm1568_vm2, %v1340_v34, %v1601_v60  ;;  %v1616_v10 = vsel %vm1568_vm2, %v1354_v61, %v1615_v49  ;;  %v1361_v47 = vadd.f32 %v1360_v32, %v1359_v43  ;;  %v2559_v50 = vpop.f32.mrb[59].mxu1 }
 0x16b   : > { %v1383_v8 = vadd.f32 %v1021_v37, %v1017_v23  ;;  %v1609_v25 = vsel %vm1568_vm2, %v1347_v59, %v1608_v45  ;;  %v1363_v11 = vrot.slane %v1362_v51, 4  ;;  %v1377_v35 = vrot.slane %v1376_v48, 4 }
 0x16c   : > { %v1370_v53 = vrot.slane %v1369_v4, 4  ;;  %v1623_v16 = vsel %vm1568_vm2, %v1361_v47, %v1622_v63  ;;  %v1022_v19 = vmul.f32 %v2506_v39, %v2445_v6  ;;  %v1024_v60 = vmul.f32 %v2511_v17, %v2449_v21  ;;  %v2567_v56 = vpop.f32.mrb[60].mxu0 }
 0x16d   : > { %v1384_v41 = vrot.slane %v1383_v8, 4  ;;  %v1364_v49 = vadd.f32 %v1363_v11, %v1362_v51  ;;  %v1378_v62 = vadd.f32 %v1377_v35, %v1376_v48  ;;  %v1023_v45 = vmul.f32 %v2516_v15, %v2451_v38  ;;  %v2571_v43 = vpop.f32.mrb[60].mxu1  ;;  %v2573_v23 = vpop.f32.mrb[61].mxu0 }
 0x16e   : > { %v1371_v54 = vadd.f32 %v1370_v53, %v1369_v4  ;;  %v1025_v22 = vmul.f32 %v2525_v26, %v2455_v46  ;;  %v1026_v6 = vmul.f32 %v2532_v55, %v2461_v9  ;;  %v1028_v21 = vmul.f32 %v2537_v31, %v2465_v12  ;;  %v2581_v40 = vpop.f32.mrb[61].mxu1 }
 0x16f   : > { %v1385_v63 = vadd.f32 %v1384_v41, %v1383_v8  ;;  %v1365_v33 = vrot.slane %v1364_v49, 2  ;;  %v1379_v58 = vrot.slane %v1378_v62, 2  ;;  %v1027_v38 = vmul.f32 %v2542_v3, %v2467_v5 }
 0x170   : > { %v1372_v34 = vrot.slane %v1371_v54, 2  ;;  %v1390_v32 = vadd.f32 %v1026_v6, %v1022_v19  ;;  %v1404_v37 = vadd.f32 %v1028_v21, %v1024_v60  ;;  %v1029_v46 = vmul.f32 %v2547_v13, %v2475_v36  ;;  %v2587_v59 = vpop.f32.mrb[62].mxu0 }
 0x171   : > { %v1386_v61 = vrot.slane %v1385_v63, 2  ;;  %v1366_v9 = vadd.f32 %v1365_v33, %v1364_v49  ;;  %v1380_v51 = vadd.f32 %v1379_v58, %v1378_v62  ;;  %v1397_v12 = vadd.f32 %v1027_v38, %v1023_v45  ;;  %v2589_v4 = vpop.f32.mrb[62].mxu1  ;;  %v2591_v47 = vpop.f32.mrb[63].mxu0 }
 0x172   : > { %v1373_v48 = vadd.f32 %v1372_v34, %v1371_v54  ;;  %2705 = vst [vmem:[#allocation6_spill] sm:$0xff] %v2589_v4  ;;  %2706 = vst [vmem:[#allocation7_spill] sm:$0xff] %v2591_v47  ;;  %v1391_v11 = vrot.slane %v1390_v32, 4  ;;  %v1405_v35 = vrot.slane %v1404_v37, 4  ;;  %v1411_v5 = vadd.f32 %v1029_v46, %v1025_v22  ;;  %v2593_v53 = vpop.f32.mrb[63].mxu1 }
 0x173   : > { %v1387_v8 = vadd.f32 %v1386_v61, %v1385_v63  ;;  %2707 = vst [vmem:[#allocation8_spill] sm:$0xff] %v2593_v53  ;;  %v1367_v41 = vrot.slane %v1366_v9, 1  ;;  %v1381_v19 = vrot.slane %v1380_v51, 1  ;;  %v1398_v36 = vrot.slane %v1397_v12, 4 }
 0x174   : > { %v1374_v60 = vrot.slane %v1373_v48, 1  ;;  %v1392_v21 = vadd.f32 %v1391_v11, %v1390_v32  ;;  %v1406_v49 = vadd.f32 %v1405_v35, %v1404_v37  ;;  %v1412_v62 = vrot.slane %v1411_v5, 4 }
 0x175   : > { %v1388_v6 = vrot.slane %v1387_v8, 1  ;;  %v1368_v54 = vadd.f32 %v1367_v41, %v1366_v9  ;;  %v1382_v45 = vadd.f32 %v1381_v19, %v1380_v51  ;;  %v1399_v58 = vadd.f32 %v1398_v36, %v1397_v12 }
 0x176   : > { %v1375_v33 = vadd.f32 %v1374_v60, %v1373_v48  ;;  %v1393_v38 = vrot.slane %v1392_v21, 2  ;;  %v1407_v63 = vrot.slane %v1406_v49, 2  ;;  %v1413_v61 = vadd.f32 %v1412_v62, %v1411_v5 }
 0x177   : > { %v1389_v34 = vadd.f32 %v1388_v6, %v1387_v8  ;;  %v1603_v22 = vsel %vm1570_vm3, %v1368_v54, %v1602_v14  ;;  %v1617_v46 = vsel %vm1570_vm3, %v1382_v45, %v1616_v10  ;;  %v1400_v47 = vrot.slane %v1399_v58, 2 }
 0x178   : > { %v1610_v53 = vsel %vm1570_vm3, %v1375_v33, %v1609_v25  ;;  %v1394_v32 = vadd.f32 %v1393_v38, %v1392_v21  ;;  %v1408_v37 = vadd.f32 %v1407_v63, %v1406_v49  ;;  %v1414_v11 = vrot.slane %v1413_v61, 2 }
 0x179   : > { %v1624_v4 = vsel %vm1570_vm3, %v1389_v34, %v1623_v16  ;;  %v1401_v9 = vadd.f32 %v1400_v47, %v1399_v58  ;;  %v1030_v51 = vmul.f32 %v2506_v39, %v2481_v7  ;;  %v1032_v48 = vmul.f32 %v2511_v17, %v2483_v18 }
 0x17a   : > { %v1031_v14 = vmul.f32 %v2516_v15, %v2485_v24  ;;  %v1395_v12 = vrot.slane %v1394_v32, 1  ;;  %v1409_v10 = vrot.slane %v1408_v37, 1  ;;  %v1415_v8 = vadd.f32 %v1414_v11, %v1413_v61 }
 0x17b   : > { %v1033_v25 = vmul.f32 %v2525_v26, %v2487_v20  ;;  %v1402_v16 = vrot.slane %v1401_v9, 1  ;;  %v1034_v35 = vmul.f32 %v2532_v55, %v2489_v57  ;;  %v1036_v47 = vmul.f32 %v2537_v31, %v2491_v28 }
 0x17c   : > { %v1035_v7 = vmul.f32 %v2542_v3, %v2493_v30  ;;  %v1396_v18 = vadd.f32 %v1395_v12, %v1394_v32  ;;  %v1410_v5 = vadd.f32 %v1409_v10, %v1408_v37  ;;  %v1416_v41 = vrot.slane %v1415_v8, 1 }
 0x17d   : > { %v1037_v24 = vmul.f32 %v2547_v13, %v2495_v44  ;;  %v1403_v19 = vadd.f32 %v1402_v16, %v1401_v9  ;;  %v1418_v60 = vadd.f32 %v1034_v35, %v1030_v51  ;;  %v1432_v36 = vadd.f32 %v1036_v47, %v1032_v48 }
 0x17e   : > { %v1425_v20 = vadd.f32 %v1035_v7, %v1031_v14  ;;  %v1604_v6 = vsel %vm1572_vm4, %v1396_v18, %v1603_v22  ;;  %v1618_v57 = vsel %vm1572_vm4, %v1410_v5, %v1617_v46  ;;  %v1417_v21 = vadd.f32 %v1416_v41, %v1415_v8 }
 0x17f   : > { %v1439_v49 = vadd.f32 %v1037_v24, %v1033_v25  ;;  %v1611_v28 = vsel %vm1572_vm4, %v1403_v19, %v1610_v53  ;;  %v1419_v62 = vrot.slane %v1418_v60, 4  ;;  %v1433_v30 = vrot.slane %v1432_v36, 4 }
 0x180   : > { %v1426_v54 = vrot.slane %v1425_v20, 4  ;;  %v1625_v45 = vsel %vm1572_vm4, %v1417_v21, %v1624_v4  ;;  %v1038_v44 = vmul.f32 %v2506_v39, %v2503_v29  ;;  %v1040_v58 = vmul.f32 %v2511_v17, %v2520_v52 }
 0x181   : > { %v1440_v33 = vrot.slane %v1439_v49, 4  ;;  %v1420_v34 = vadd.f32 %v1419_v62, %v1418_v60  ;;  %v1434_v38 = vadd.f32 %v1433_v30, %v1432_v36  ;;  %v1039_v61 = vmul.f32 %v2516_v15, %v2522_v27 }
 0x182   : > { %v1427_v63 = vadd.f32 %v1426_v54, %v1425_v20  ;;  %v1041_v53 = vmul.f32 %v2525_v26, %v2529_v1  ;;  %v1042_v4 = vmul.f32 %v2532_v55, %v2551_v2  ;;  %v1044_v46 = vmul.f32 %v2537_v31, %v2553_v0 }
 0x183   : > { %v1441_v22 = vadd.f32 %v1440_v33, %v1439_v49  ;;  %v1421_v29 = vrot.slane %v1420_v34, 2  ;;  %v1435_v32 = vrot.slane %v1434_v38, 2  ;;  %v1043_v52 = vmul.f32 %v2542_v3, %v2555_v42 }
 0x184   : > { %v1428_v37 = vrot.slane %v1427_v63, 2  ;;  %v1446_v9 = vadd.f32 %v1042_v4, %v1038_v44  ;;  %v1460_v51 = vadd.f32 %v1044_v46, %v1040_v58  ;;  %v1045_v27 = vmul.f32 %v2547_v13, %v2559_v50  ;;  %v2708_v46 = vld [vmem:[#allocation6_spill] sm:$0xff] }
 0x185   : > { %v1442_v11 = vrot.slane %v1441_v22, 2  ;;  %v1422_v48 = vadd.f32 %v1421_v29, %v1420_v34  ;;  %v1436_v1 = vadd.f32 %v1435_v32, %v1434_v38  ;;  %v1453_v12 = vadd.f32 %v1043_v52, %v1039_v61 }
 0x186   : > { %v1429_v14 = vadd.f32 %v1428_v37, %v1427_v63  ;;  %v1447_v10 = vrot.slane %v1446_v9, 4  ;;  %v1461_v8 = vrot.slane %v1460_v51, 4  ;;  %v1467_v0 = vadd.f32 %v1045_v27, %v1041_v53 }
 0x187   : > { %v1443_v2 = vadd.f32 %v1442_v11, %v1441_v22  ;;  %v1423_v25 = vrot.slane %v1422_v48, 1  ;;  %v1437_v16 = vrot.slane %v1436_v1, 1  ;;  %v1454_v47 = vrot.slane %v1453_v12, 4 }
 0x188   : > { %v1430_v35 = vrot.slane %v1429_v14, 1  ;;  %v1448_v42 = vadd.f32 %v1447_v10, %v1446_v9  ;;  %v1462_v18 = vadd.f32 %v1461_v8, %v1460_v51  ;;  %v1468_v5 = vrot.slane %v1467_v0, 4 }
 0x189   : > { %v1444_v7 = vrot.slane %v1443_v2, 1  ;;  %v1424_v41 = vadd.f32 %v1423_v25, %v1422_v48  ;;  %v1438_v24 = vadd.f32 %v1437_v16, %v1436_v1  ;;  %v1455_v50 = vadd.f32 %v1454_v47, %v1453_v12 }
 0x18a   : > { %v1431_v19 = vadd.f32 %v1430_v35, %v1429_v14  ;;  %v1449_v36 = vrot.slane %v1448_v42, 2  ;;  %v1463_v20 = vrot.slane %v1462_v18, 2  ;;  %v1469_v21 = vadd.f32 %v1468_v5, %v1467_v0 }
 0x18b   : > { %v1445_v60 = vadd.f32 %v1444_v7, %v1443_v2  ;;  %v1605_v49 = vsel %vm1574_vm5, %v1424_v41, %v1604_v6  ;;  %v1619_v62 = vsel %vm1574_vm5, %v1438_v24, %v1618_v57  ;;  %v1456_v54 = vrot.slane %v1455_v50, 2  ;;  %v922_v24 = vld [vmem:[#allocation2 + $0x20] sm:$0xff] }
 0x18c   : > { %v1612_v30 = vsel %vm1574_vm5, %v1431_v19, %v1611_v28  ;;  %v1450_v44 = vadd.f32 %v1449_v36, %v1448_v42  ;;  %v1464_v58 = vadd.f32 %v1463_v20, %v1462_v18  ;;  %v1470_v34 = vrot.slane %v1469_v21, 2  ;;  %v923_v36 = vld [vmem:[#allocation2 + $0x28] sm:$0xff] }
 0x18d   : > { %v1626_v33 = vsel %vm1574_vm5, %v1445_v60, %v1625_v45  ;;  %v1457_v38 = vadd.f32 %v1456_v54, %v1455_v50  ;;  %v1046_v63 = vmul.f32 %v2506_v39, %v2567_v56  ;;  %v1048_v61 = vmul.f32 %v2511_v17, %v2571_v43  ;;  %v2709_v39 = vld [vmem:[#allocation7_spill] sm:$0xff]  ;;  %v924_v50 = vld [vmem:[#allocation2 + $0x30] sm:$0xff] }
 0x18e   : > { %v1047_v6 = vmul.f32 %v2516_v15, %v2573_v23  ;;  %v1451_v22 = vrot.slane %v1450_v44, 1  ;;  %v1465_v57 = vrot.slane %v1464_v58, 1  ;;  %v1471_v53 = vadd.f32 %v1470_v34, %v1469_v21  ;;  %v2710_v15 = vld [vmem:[#allocation8_spill] sm:$0xff]  ;;  %v925_v21 = vld [vmem:[#allocation2 + $0x38] sm:$0xff] }
 0x18f   : > { %v1049_v28 = vmul.f32 %v2525_v26, %v2581_v40  ;;  %v1458_v45 = vrot.slane %v1457_v38, 1  ;;  %v1050_v4 = vmul.f32 %v2532_v55, %v2587_v59  ;;  %v1052_v29 = vmul.f32 %v2537_v31, %v2708_v46 }
 0x190   : > { %v1051_v56 = vmul.f32 %v2542_v3, %v2709_v39  ;;  %v1452_v17 = vadd.f32 %v1451_v22, %v1450_v44  ;;  %v1466_v43 = vadd.f32 %v1465_v57, %v1464_v58  ;;  %v1472_v32 = vrot.slane %v1471_v53, 1 }
 0x191   : > { %v1053_v23 = vmul.f32 %v2547_v13, %v2710_v15  ;;  %v1459_v37 = vadd.f32 %v1458_v45, %v1457_v38  ;;  %v1474_v52 = vadd.f32 %v1050_v4, %v1046_v63  ;;  %v1488_v11 = vadd.f32 %v1052_v29, %v1048_v61  ;;  %v1657_v63 = vld [vmem:[#allocation2] sm:$0xff] (!%p1862_p6)  ;;  %v1658_v61 = vld [vmem:[#allocation2 + $0x8] sm:$0xff] (!%p1862_p6) }
 0x192   : > { %v1481_v26 = vadd.f32 %v1051_v56, %v1047_v6  ;;  %v1606_v40 = vsel %vm1576_vm6, %v1452_v17, %v1605_v49  ;;  %v1620_v55 = vsel %vm1576_vm6, %v1466_v43, %v1619_v62  ;;  %v1473_v59 = vadd.f32 %v1472_v32, %v1471_v53  ;;  %v1659_v6 = vld [vmem:[#allocation2 + $0x10] sm:$0xff] (!%p1862_p6) }
 0x193   : > { %v1495_v9 = vadd.f32 %v1053_v23, %v1049_v28  ;;  %v1613_v31 = vsel %vm1576_vm6, %v1459_v37, %v1612_v30  ;;  %v1475_v51 = vrot.slane %v1474_v52, 4  ;;  %v1489_v3 = vrot.slane %v1488_v11, 4  ;;  %v1660_v28 = vld [vmem:[#allocation2 + $0x18] sm:$0xff] (!%p1862_p6) }
 0x194   : > { %v1482_v27 = vrot.slane %v1481_v26, 4  ;;  %v1627_v48 = vsel %vm1576_vm6, %v1473_v59, %v1626_v33  ;;  %v1665_v22 = vmax.f32 (!%p1862_p6), %v1657_v63, 0.0  ;;  %v1666_v57 = vmax.f32 (!%p1862_p6), %v1658_v61, 0.0 }
 0x195   : > { %v1496_v1 = vrot.slane %v1495_v9, 4  ;;  %v1476_v14 = vadd.f32 %v1475_v51, %v1474_v52  ;;  %v1490_v13 = vadd.f32 %v1489_v3, %v1488_v11  ;;  %v1667_v53 = vmax.f32 (!%p1862_p6), %v1659_v6, 0.0 }
 0x196   : > { %v1483_v12 = vadd.f32 %v1482_v27, %v1481_v26  ;;  %v1668_v46 = vmax.f32 (!%p1862_p6), %v1660_v28, 0.0  ;;  %v1673_v43 = vmin.f32 (!%p1862_p6), %v1665_v22, 1.0  ;;  %v1674_v32 = vmin.f32 (!%p1862_p6), %v1666_v57, 1.0 }
 0x197   : > { %v1497_v2 = vadd.f32 %v1496_v1, %v1495_v9  ;;  %v1477_v10 = vrot.slane %v1476_v14, 2  ;;  %v1491_v8 = vrot.slane %v1490_v13, 2  ;;  %v1675_v15 = vmin.f32 (!%p1862_p6), %v1667_v53, 1.0 }
 0x198   : > { %v1484_v0 = vrot.slane %v1483_v12, 2  ;;  %v1676_v37 = vmin.f32 (!%p1862_p6), %v1668_v46, 1.0  ;;  %1681 = vst [vmem:[#allocation3] sm:$0xff] (!%p1862_p6), %v1673_v43  ;;  %1682 = vst [vmem:[#allocation3 + $0x8] sm:$0xff] (!%p1862_p6), %v1674_v32 }
 0x199   : > { %v1498_v25 = vrot.slane %v1497_v2, 2  ;;  %v1478_v16 = vadd.f32 %v1477_v10, %v1476_v14  ;;  %v1492_v35 = vadd.f32 %v1491_v8, %v1490_v13  ;;  %1683 = vst [vmem:[#allocation3 + $0x10] sm:$0xff] (!%p1862_p6), %v1675_v15 }
 0x19a   : > { %v1485_v47 = vadd.f32 %v1484_v0, %v1483_v12  ;;  %1684 = vst [vmem:[#allocation3 + $0x18] sm:$0xff] (!%p1862_p6), %v1676_v37 }
 0x19b   : > { %v1499_v7 = vadd.f32 %v1498_v25, %v1497_v2  ;;  %v1479_v42 = vrot.slane %v1478_v16, 1  ;;  %v1493_v18 = vrot.slane %v1492_v35, 1 }
 0x19c   : > { %v1486_v5 = vrot.slane %v1485_v47, 1 }
 0x19d   : > { %v1500_v41 = vrot.slane %v1499_v7, 1  ;;  %v1480_v19 = vadd.f32 %v1479_v42, %v1478_v16  ;;  %v1494_v60 = vadd.f32 %v1493_v18, %v1492_v35 }
 0x19e   : > { %v1487_v20 = vadd.f32 %v1486_v5, %v1485_v47  ;;  %1656 = sbr.rel (%p1862_p6) target bundleno = 433 (0x1b1), region = 40 }
 0x19f   : > { %v1501_v49 = vadd.f32 %v1500_v41, %v1499_v7  ;;  %v1607_v62 = vsel %vm1578_vm7, %v1480_v19, %v1606_v40  ;;  %v1621_v30 = vsel %vm1578_vm7, %v1494_v60, %v1620_v55 }
 0x1a0   : > { %v1614_v54 = vsel %vm1578_vm7, %v1487_v20, %v1613_v31  ;;  %v1641_v33 = vadd.f32 %v1607_v62, %v922_v24  ;;  %v1643_v44 = vadd.f32 %v1621_v30, %v924_v50 }
 0x1a1   : > { %v1642_v58 = vadd.f32 %v1614_v54, %v923_v36  ;;  %v1628_v34 = vsel %vm1578_vm7, %v1501_v49, %v1627_v48 }
 0x1a2   : > { %v1644_v38 = vadd.f32 %v1628_v34, %v925_v21  ;;  %1649 = vst [vmem:[#allocation2 + $0x20] sm:$0xff] %v1641_v33  ;;  %1651 = vst [vmem:[#allocation2 + $0x30] sm:$0xff] %v1643_v44 }
 0x1a3   : > { %1650 = vst [vmem:[#allocation2 + $0x28] sm:$0xff] %v1642_v58 }
 0x1a4   : > { %1652 = vst [vmem:[#allocation2 + $0x38] sm:$0xff] %v1644_v38 }
 0x1a9   : > { %v1661_v45 = vld [vmem:[#allocation2 + $0x20] sm:$0xff]  ;;  %v1663_v56 = vld [vmem:[#allocation2 + $0x30] sm:$0xff] }
 0x1aa   : > { %v1662_v4 = vld [vmem:[#allocation2 + $0x28] sm:$0xff]  ;;  %v1669_v29 = vmax.f32 %v1661_v45, 0.0  ;;  %v1671_v23 = vmax.f32 %v1663_v56, 0.0 }
 0x1ab   : > { %v1670_v39 = vmax.f32 %v1662_v4, 0.0  ;;  %v1664_v17 = vld [vmem:[#allocation2 + $0x38] sm:$0xff] }
 0x1ac   : > { %v1677_v52 = vmin.f32 %v1669_v29, 1.0  ;;  %v1672_v26 = vmax.f32 %v1664_v17, 0.0  ;;  %v1679_v40 = vmin.f32 %v1671_v23, 1.0 }
 0x1ad   : > { %v1678_v11 = vmin.f32 %v1670_v39, 1.0 }
 0x1ae   : > { %1685 = vst [vmem:[#allocation3 + $0x20] sm:$0xff] %v1677_v52  ;;  %v1680_v55 = vmin.f32 %v1672_v26, 1.0  ;;  %1687 = vst [vmem:[#allocation3 + $0x30] sm:$0xff] %v1679_v40 }
 0x1af   : > { %1686 = vst [vmem:[#allocation3 + $0x28] sm:$0xff] %v1678_v11 }
 0x1b0   : > { %1688 = vst [vmem:[#allocation3 + $0x38] sm:$0xff] %v1680_v55 }
 0x1b1 PF: > { %p2666_p7 = scmp.eq.s32.totalorder %s1787_s15, 2  ;;  %s1977_s30 = smov [#allocation3]  }
 0x1b2   : > { %s1698_s4 = sshll.u32 %s1977_s30, 4  ;;  %s1699_s4 = int_to_ptr.vmem [resolvable:$true] %s1698_s4 }
 0x1b3   : > { %s1921_s5 = scalar_lea.vmem %s1699_s4, 1024  ;;  %p1928_p11 = scmp.lt.s32.totalorder %s1699_s4, %s1699_s4 }
 0x1b4   : > { %p1922_p8 = scmp.ne.s32.totalorder %s1699_s4, %s1921_s5  ;;  %p1929_p12 = scmp.lt.s32.totalorder %s1921_s5, %s1921_s5 }
 0x1b6   : > { %p1923_p9 = pnand %p1922_p8, %p2666_p7  ;;  %p1930_p13 = por %p1929_p12, %p1928_p11 }
 0x1b8   : > { %p1924_p10 = pneg %p1923_p9 }
 0x1ba   : > { %p1931_p0 = pnand %p1930_p13, %p1924_p10 }
 0x1bc   : > { %1934 = shalt.err (!%p1931_p0)
}
 0x1bd   : > { %s1935_s8 = scalar_lea.hbm %s2704_s3, 1024 }
 0x1be   : > { %p1936_p1 = scmp.ne.s32.totalorder %s2704_s3, %s1935_s8  ;;  %p1941_p4 = scmp.lt.u32.totalorder %s1935_s8, %s2704_s3 }
 0x1c0   : > { %p1937_p2 = pnand %p1936_p1, %p2666_p7 }
 0x1c2   : > { %p1938_p3 = pneg %p1937_p2 }
 0x1c4   : > { %p1943_p5 = pnand %p1941_p4, %p1938_p3 }
 0x1c6   : > { %1946 = shalt.err (!%p1943_p5)
}
 0x1c7   : > { %s1978_s15 = smov 512   ;;  %s1979_s17 = smov 32  }
 0x1c8   : > { %1879 = dma.vmem_to_hbm [thread:$0]  (%p2666_p7), %s1699_s4, 1024, %s2704_s3, [#allocation4], %s1978_s15, %s1978_s15, %s1979_s17  }
 0x1c9   : > { %1960 = dma.done.wait (%p2666_p7), [#allocation4], 1024  }
 0x1ca   : > { %1962 = vsyncadd (%p2666_p7), [#allocation4], 4294966272 }
 0x1cb PF: > { %s14_s14 = sadd.s32 1, %s1973_s14   ;;  %s2712_s12 = smov %s1969_s13 }
 0x1cc   : > { %p11_p6 = scmp.ge.s32.totalorder %s14_s14, 5   ;;  %s2713_s13 = smov %s2715_s16 }
 0x1ce   :  { %13 = sbr.rel (!%p11_p6) target bundleno = 2 (0x2), region = 74 }
 0x1d5   :  { %1714 = vsyncpa [#allocation4], 1 }
 0x1d6   :  { %1716 = vsyncpa [#allocation4 + $0x1], 1 }

</bundles_post_ra>
